<compile_context>
chip_gen: v5e
topology: v5e:2x2
jax: 0.10.0
libtpu: 0.0.40
codegen_flags: <defaults>
</compile_context>

<pallas_src>
import numpy as np
import jax
import jax.numpy as jnp
from jax.experimental import pallas as pl
from jax.experimental.pallas import tpu as pltpu

BN_EPS = 1e-5


# ----------------------------------------------------------------------------
# Host-side static constants (numpy; zero runtime cost)
# ----------------------------------------------------------------------------
def _shift_mats(R):
    """sh[di] @ a_ext  ==  a_ext[di : di + R]  (0/1 row shift-select)."""
    sh = np.zeros((3, R, R + 2), np.float32)
    for di in range(3):
        sh[di, np.arange(R), np.arange(R) + di] = 1.0
    return sh


def _conv_band_weights(w_conv, H, W):
    """Block-Toeplitz weights bw[di]: (Wp*Cin, W*Cout); row-slab @ bw[di] applies
    the di-th kernel row of the 3x3 conv (stride 1, pad 1) to every output col."""
    Cout, Cin, _, _ = w_conv.shape
    Wp = W + 2
    bw = np.zeros((3, Wp * Cin, W * Cout), np.float32)
    for di in range(3):
        for wo in range(1, W + 1):          # output w, padded coords
            for dj in range(3):
                wj = wo + dj - 1            # input column block, 0..Wp-1
                bw[di, wj * Cin:(wj + 1) * Cin,
                   (wo - 1) * Cout:wo * Cout] = w_conv[:, :, di, dj].T
    return bw


def _row_mask(N, H):
    """1.0 on valid (interior) conv-output rows, 0.0 on padded/garbage rows."""
    Hp = H + 2
    m = np.zeros((N * Hp, 1), np.float32)
    for n in range(N):
        m[n * Hp + 1:n * Hp + 1 + H, 0] = 1.0
    return m


def _channel_mean_mat(W, C, count):
    """(W*C, W*C): sums each channel over its W column blocks, divides by count."""
    return (np.kron(np.ones((W, W), np.float32),
                    np.eye(C, dtype=np.float32)) / float(count))


def _pool_row_select(N, H):
    """rsel[a] @ y picks conv rows (n, 2*ho+1+a) into next-layer slab rows
    (zero rows give the next layer's zero padding for free)."""
    Hp, Ho = H + 2, H // 2
    Hp2 = Ho + 2
    rs = np.zeros((2, N * Hp2 + 2, N * Hp), np.float32)
    for a in range(2):
        for n in range(N):
            for ho in range(Ho):
                rs[a, 1 + n * Hp2 + ho + 1, n * Hp + 2 * ho + 1 + a] = 1.0
    return rs


def _pool_col_select(W, C):
    """csel[b] maps columns (2*wo+b, c) into next-layer columns (wo+1, c)."""
    Wo = W // 2
    Wp2 = Wo + 2
    cs = np.zeros((2, W * C, Wp2 * C), np.float32)
    for b in range(2):
        for wo in range(Wo):
            for c in range(C):
                cs[b, (2 * wo + b) * C + c, (wo + 1) * C + c] = 1.0
    return cs


def _head_consts(N, Ho, Wo, C, w1):
    """Per-ho row selector over the last pooled slab + the matching slice of w1
    with torch's NCHW x.view(N, -1) permutation folded into its rows."""
    Hp2, Wp2 = Ho + 2, Wo + 2
    fo = w1.shape[1]
    sels, w1hs = [], []
    for ho in range(Ho):
        s = np.zeros((N, N * Hp2 + 2), np.float32)
        for n in range(N):
            s[n, 1 + n * Hp2 + ho + 1] = 1.0
        wh = np.zeros((Wp2 * C, fo), np.float32)
        for wo in range(Wo):
            for c in range(C):
                wh[(wo + 1) * C + c, :] = w1[c * Ho * Wo + ho * Wo + wo, :]
        sels.append(s)
        w1hs.append(wh)
    return sels, w1hs


# ----------------------------------------------------------------------------
# The single fused Pallas kernel
# ----------------------------------------------------------------------------
def _make_kernel(num_layers, ho_last):
    """Kernel argument layout (all VMEM refs, in order):
       a0_ext,
       per layer: sh0, sh1, sh2, bw0, bw1, bw2, rowmask, gmean, gamma_b, beta_b,
                  rsel0, rsel1, csel0, csel1,
       per output row of the last pooled map: selh, w1h,
       b1, w2, b2, w3, b3,  out_ref"""
    def kernel(*refs):
        out_ref = refs[-1]
        idx = 0
        a = refs[idx][...]; idx += 1                     # (R0+2, Wp0*Cin0) slab

        for _ in range(num_layers):
            sh = [refs[idx + t] for t in range(3)]; idx += 3
            bw = [refs[idx + t] for t in range(3)]; idx += 3
            rowmask = refs[idx][...]
            gmean = refs[idx + 1][...]
            gamma_b = refs[idx + 2][...]
            beta_b = refs[idx + 3][...]
            idx += 4
            rsel = [refs[idx], refs[idx + 1]]; idx += 2
            csel = [refs[idx], refs[idx + 1]]; idx += 2

            # conv3x3 (stride 1, pad 1): banded matmuls over row-shifted slabs.
            # Bias is omitted on purpose: it cancels under training-mode BN.
            z = None
            for di in range(3):
                a_sh = jnp.dot(sh[di][...], a, preferred_element_type=jnp.float32)
                t = jnp.dot(a_sh, bw[di][...], preferred_element_type=jnp.float32)
                z = t if z is None else z + t

            # BatchNorm2d (training mode, biased variance) + ReLU.
            # gmean sums each channel over width and divides by N*H*W; rowmask
            # removes the (never consumed) padded rows from the statistics.
            zm = z * rowmask
            mean_b = jnp.sum(jnp.dot(zm, gmean, preferred_element_type=jnp.float32),
                             axis=0, keepdims=True)
            cent = z - mean_b
            var_b = jnp.sum(jnp.dot(cent * cent * rowmask, gmean,
                                    preferred_element_type=jnp.float32),
                            axis=0, keepdims=True)
            y = jnp.maximum(
                cent * (gamma_b * jax.lax.rsqrt(var_b + BN_EPS)) + beta_b, 0.0)

            # 2x2 max-pool + zero re-pad into the next layer's slab layout,
            # expressed as a max over four 0/1 row/column selection matmuls.
            nxt = None
            for ra in rsel:
                tr = jnp.dot(ra[...], y, preferred_element_type=jnp.float32)
                for cb in csel:
                    p = jnp.dot(tr, cb[...], preferred_element_type=jnp.float32)
                    nxt = p if nxt is None else jnp.maximum(nxt, p)
            a = nxt

        # FC head: fc -> linear1 -> linear2 (no activations). The NCHW flatten
        # permutation is folded into w1h, so no transpose / HBM round trip.
        acc = None
        for _ in range(ho_last):
            sel = refs[idx][...]
            w1h = refs[idx + 1][...]
            idx += 2
            tr = jnp.dot(sel, a, preferred_element_type=jnp.float32)
            t = jnp.dot(tr, w1h, preferred_element_type=jnp.float32)
            acc = t if acc is None else acc + t
        b1 = refs[idx][...]; w2 = refs[idx + 1][...]; b2 = refs[idx + 2][...]
        w3 = refs[idx + 3][...]; b3 = refs[idx + 4][...]
        acc = acc + b1
        acc = jnp.dot(acc, w2, preferred_element_type=jnp.float32) + b2
        out_ref[...] = jnp.dot(acc, w3, preferred_element_type=jnp.float32) + b3

    return kernel


# ----------------------------------------------------------------------------
# Wrapper
# ----------------------------------------------------------------------------
def convnet_layers_forward(x_nchw, conv_params, fc_params):
    """Replicates ConvNetLayers.forward (training-mode BN, dropout_rate=0)."""
    N, cin, H, W = (int(d) for d in x_nchw.shape)

    flops_total = 0

    def _mm(m, k, n):
        nonlocal flops_total
        flops_total += 2 * m * k * n

    consts = []
    h, w, c = H, W, cin
    for (w_conv, _bias, gamma, beta) in conv_params:
        # _bias is generated for parameter parity with nn.Conv2d but unused:
        # training-mode BatchNorm subtracts the batch mean, so it cancels exactly.
        w_np = np.asarray(w_conv, np.float32)
        cout, cin_l, kh, kw = w_np.shape
        assert (kh, kw) == (3, 3) and cin_l == c, "only k=3, stride=1, pad=1"
        assert h % 2 == 0 and w % 2 == 0, "MaxPool2d(2) path needs even H, W"
        Hp, Wp = h + 2, w + 2
        R = N * Hp
        ho, wo = h // 2, w // 2
        R2 = N * (ho + 2)

        sh = _shift_mats(R)
        bw = _conv_band_weights(w_np, h, w)
        rowmask = _row_mask(N, h)
        gmean = _channel_mean_mat(w, cout, N * h * w)
        gamma_b = np.tile(np.asarray(gamma, np.float32).reshape(1, cout), (1, w))
        beta_b = np.tile(np.asarray(beta, np.float32).reshape(1, cout), (1, w))
        rs = _pool_row_select(N, h)
        cs = _pool_col_select(w, cout)
        consts += [sh[0], sh[1], sh[2], bw[0], bw[1], bw[2],
                   rowmask, gmean, gamma_b, beta_b, rs[0], rs[1], cs[0], cs[1]]

        for _ in range(3):
            _mm(R, R + 2, Wp * c)
            _mm(R, Wp * c, w * cout)
        _mm(R, w * cout, w * cout)
        _mm(R, w * cout, w * cout)
        for _ in range(2):
            _mm(R2 + 2, R, w * cout)
        for _ in range(4):
            _mm(R2 + 2, w * cout, (wo + 2) * cout)

        h, w, c = ho, wo, cout

    (w1, b1), (w2, b2), (w3, b3) = fc_params
    w1_np = np.asarray(w1, np.float32)
    assert w1_np.shape[0] == c * h * w, "fc input size mismatch"
    sels, w1hs = _head_consts(N, h, w, c, w1_np)
    for s, wh in zip(sels, w1hs):
        consts += [s, wh]
    consts += [np.asarray(b1, np.float32), np.asarray(w2, np.float32),
               np.asarray(b2, np.float32), np.asarray(w3, np.float32),
               np.asarray(b3, np.float32)]
    num_out = int(np.asarray(w3).shape[1])

    for _ in range(h):
        _mm(N, N * (h + 2) + 2, (w + 2) * c)
        _mm(N, (w + 2) * c, int(w1_np.shape[1]))
    _mm(N, int(w1_np.shape[1]), int(np.asarray(w2).shape[1]))
    _mm(N, int(np.asarray(w2).shape[1]), num_out)

    kernel = _make_kernel(len(conv_params), h)
    const_arrays = [jnp.asarray(cst, jnp.float32) for cst in consts]

    in_shapes = [(N * (H + 2) + 2, (W + 2) * cin)]
    in_shapes += [tuple(int(d) for d in a.shape) for a in const_arrays]
    in_specs = [pl.BlockSpec(s, lambda *args, _n=len(s): (0,) * _n)
                for s in in_shapes]
    bytes_accessed = 4 * (sum(int(np.prod(s)) for s in in_shapes) + N * num_out)

    fused = pl.pallas_call(
        kernel,
        out_shape=jax.ShapeDtypeStruct((N, num_out), jnp.float32),
        in_specs=in_specs,
        out_specs=pl.BlockSpec((N, num_out), lambda: (0, 0)),
        compiler_params=pltpu.CompilerParams(vmem_limit_bytes=32 * 1024 * 1024),
        cost_estimate=pl.CostEstimate(flops=int(flops_total), transcendentals=0,
                                      bytes_accessed=int(bytes_accessed)),
    )

    def _forward(x, *cargs):
        # Only runtime glue left: NCHW -> zero-padded (N*Hp, Wp*Cin) row slab
        # with one extra zero row at each end (for the in-kernel row shifts).
        xp = jnp.pad(jnp.transpose(x, (0, 2, 3, 1)),
                     ((0, 0), (1, 1), (1, 1), (0, 0)))
        a0 = jnp.pad(xp.reshape(N * (H + 2), (W + 2) * cin), ((1, 1), (0, 0)))
        return fused(a0, *cargs)

    return jax.jit(_forward)(x_nchw, *const_arrays)


# ----------------------------------------------------------------------------
# Deterministic parameter construction (mirrors the PyTorch module shapes)
# ----------------------------------------------------------------------------
def init_params(layer_specs, in_hw, key):
    conv_params = []
    for spec in layer_specs:
        cin, cout = spec['in_channels'], spec['out_channels']
        k = spec.get('kernel_size', 3)
        key, kw, kb = jax.random.split(key, 3)
        bound = 1.0 / float(np.sqrt(cin * k * k))
        w = jax.random.uniform(kw, (cout, cin, k, k), jnp.float32, -bound, bound)
        b = jax.random.uniform(kb, (cout,), jnp.float32, -bound, bound)  # unused (BN)
        gamma = jnp.ones((cout,), jnp.float32)    # BatchNorm2d default init
        beta = jnp.zeros((cout,), jnp.float32)
        conv_params.append((w, b, gamma, beta))

    h, w_ = in_hw
    for _ in layer_specs:
        h, w_ = h // 2, w_ // 2
    num_features = layer_specs[-1]['out_channels'] * h * w_

    fc_dims = [(num_features, 32), (32, 32), (32, 10)]
    fc_params = []
    for (fi, fo) in fc_dims:
        key, kw, kb = jax.random.split(key, 3)
        bound = 1.0 / float(np.sqrt(fi))
        wmat = jax.random.uniform(kw, (fi, fo), jnp.float32, -bound, bound)
        bvec = jax.random.uniform(kb, (1, fo), jnp.float32, -bound, bound)
        fc_params.append((wmat, bvec))
    return conv_params, fc_params


if __name__ == "__main__":
    layer_specs = [
        {'in_channels': 4, 'out_channels': 8},
        {'in_channels': 8, 'out_channels': 8},
    ]
    key = jax.random.PRNGKey(0)
    key, kx = jax.random.split(key)
    x = jax.random.normal(kx, (2, 4, 16, 16), jnp.float32)   # NCHW input
    conv_params, fc_params = init_params(layer_specs, (16, 16), key)

    # TODO(synk): Dropout2d is inactive for the default dropout_rate=0.0 spec and
    # BN running-stat buffer updates are a training side effect, not part of the
    # forward output; neither is emitted.
    out = convnet_layers_forward(x, conv_params, fc_params)
    out = jax.block_until_ready(out)
    assert out.shape == (2, 10), out.shape
    assert bool(jnp.all(jnp.isfinite(out)))
    print("KERNEL_OK")
</pallas_src>

<mosaic_0001>
module attributes {stable_mosaic.version = 11 : i64} {
  func.func @kernel(%arg0: memref<38x72xf32, #tpu.memory_space<vmem>>, %arg1: memref<36x38xf32, #tpu.memory_space<vmem>>, %arg2: memref<36x38xf32, #tpu.memory_space<vmem>>, %arg3: memref<36x38xf32, #tpu.memory_space<vmem>>, %arg4: memref<72x128xf32, #tpu.memory_space<vmem>>, %arg5: memref<72x128xf32, #tpu.memory_space<vmem>>, %arg6: memref<72x128xf32, #tpu.memory_space<vmem>>, %arg7: memref<36x1xf32, #tpu.memory_space<vmem>>, %arg8: memref<128x128xf32, #tpu.memory_space<vmem>>, %arg9: memref<1x128xf32, #tpu.memory_space<vmem>>, %arg10: memref<1x128xf32, #tpu.memory_space<vmem>>, %arg11: memref<22x36xf32, #tpu.memory_space<vmem>>, %arg12: memref<22x36xf32, #tpu.memory_space<vmem>>, %arg13: memref<128x80xf32, #tpu.memory_space<vmem>>, %arg14: memref<128x80xf32, #tpu.memory_space<vmem>>, %arg15: memref<20x22xf32, #tpu.memory_space<vmem>>, %arg16: memref<20x22xf32, #tpu.memory_space<vmem>>, %arg17: memref<20x22xf32, #tpu.memory_space<vmem>>, %arg18: memref<80x64xf32, #tpu.memory_space<vmem>>, %arg19: memref<80x64xf32, #tpu.memory_space<vmem>>, %arg20: memref<80x64xf32, #tpu.memory_space<vmem>>, %arg21: memref<20x1xf32, #tpu.memory_space<vmem>>, %arg22: memref<64x64xf32, #tpu.memory_space<vmem>>, %arg23: memref<1x64xf32, #tpu.memory_space<vmem>>, %arg24: memref<1x64xf32, #tpu.memory_space<vmem>>, %arg25: memref<14x20xf32, #tpu.memory_space<vmem>>, %arg26: memref<14x20xf32, #tpu.memory_space<vmem>>, %arg27: memref<64x48xf32, #tpu.memory_space<vmem>>, %arg28: memref<64x48xf32, #tpu.memory_space<vmem>>, %arg29: memref<2x14xf32, #tpu.memory_space<vmem>>, %arg30: memref<48x32xf32, #tpu.memory_space<vmem>>, %arg31: memref<2x14xf32, #tpu.memory_space<vmem>>, %arg32: memref<48x32xf32, #tpu.memory_space<vmem>>, %arg33: memref<2x14xf32, #tpu.memory_space<vmem>>, %arg34: memref<48x32xf32, #tpu.memory_space<vmem>>, %arg35: memref<2x14xf32, #tpu.memory_space<vmem>>, %arg36: memref<48x32xf32, #tpu.memory_space<vmem>>, %arg37: memref<1x32xf32, #tpu.memory_space<vmem>>, %arg38: memref<32x32xf32, #tpu.memory_space<vmem>>, %arg39: memref<1x32xf32, #tpu.memory_space<vmem>>, %arg40: memref<32x10xf32, #tpu.memory_space<vmem>>, %arg41: memref<1x10xf32, #tpu.memory_space<vmem>>, %arg42: memref<2x10xf32, #tpu.memory_space<vmem>>) attributes {dimension_semantics = [], scalar_prefetch = 0 : i64, scratch_operands = 0 : i64, tpu.core_type = #tpu.core_type<tc>} {
    %c0 = arith.constant 0 : index
    %c0_0 = arith.constant 0 : index
    %0 = vector.load %arg0[%c0, %c0_0] : memref<38x72xf32, #tpu.memory_space<vmem>>, vector<38x72xf32>
    %c0_1 = arith.constant 0 : index
    %c0_2 = arith.constant 0 : index
    %1 = vector.load %arg7[%c0_1, %c0_2] : memref<36x1xf32, #tpu.memory_space<vmem>>, vector<36x1xf32>
    %c0_3 = arith.constant 0 : index
    %c0_4 = arith.constant 0 : index
    %2 = vector.load %arg8[%c0_3, %c0_4] : memref<128x128xf32, #tpu.memory_space<vmem>>, vector<128x128xf32>
    %c0_5 = arith.constant 0 : index
    %c0_6 = arith.constant 0 : index
    %3 = vector.load %arg9[%c0_5, %c0_6] : memref<1x128xf32, #tpu.memory_space<vmem>>, vector<1x128xf32>
    %c0_7 = arith.constant 0 : index
    %c0_8 = arith.constant 0 : index
    %4 = vector.load %arg10[%c0_7, %c0_8] : memref<1x128xf32, #tpu.memory_space<vmem>>, vector<1x128xf32>
    %c0_9 = arith.constant 0 : index
    %c0_10 = arith.constant 0 : index
    %5 = vector.load %arg1[%c0_9, %c0_10] : memref<36x38xf32, #tpu.memory_space<vmem>>, vector<36x38xf32>
    %cst = arith.constant dense<0.000000e+00> : vector<36x72xf32>
    %6 = tpu.matmul %5, %0, %cst {dimension_numbers = #tpu.dot_dimension_numbers<[1], [0], [0], [1], [0, 0, 1, 1], [], []>} : vector<36x38xf32>, vector<38x72xf32>, vector<36x72xf32> -> vector<36x72xf32>
    %c0_11 = arith.constant 0 : index
    %c0_12 = arith.constant 0 : index
    %7 = vector.load %arg4[%c0_11, %c0_12] : memref<72x128xf32, #tpu.memory_space<vmem>>, vector<72x128xf32>
    %cst_13 = arith.constant dense<0.000000e+00> : vector<36x128xf32>
    %8 = tpu.matmul %6, %7, %cst_13 {dimension_numbers = #tpu.dot_dimension_numbers<[1], [0], [0], [1], [0, 0, 1, 1], [], []>} : vector<36x72xf32>, vector<72x128xf32>, vector<36x128xf32> -> vector<36x128xf32>
    %c0_14 = arith.constant 0 : index
    %c0_15 = arith.constant 0 : index
    %9 = vector.load %arg2[%c0_14, %c0_15] : memref<36x38xf32, #tpu.memory_space<vmem>>, vector<36x38xf32>
    %cst_16 = arith.constant dense<0.000000e+00> : vector<36x72xf32>
    %10 = tpu.matmul %9, %0, %cst_16 {dimension_numbers = #tpu.dot_dimension_numbers<[1], [0], [0], [1], [0, 0, 1, 1], [], []>} : vector<36x38xf32>, vector<38x72xf32>, vector<36x72xf32> -> vector<36x72xf32>
    %c0_17 = arith.constant 0 : index
    %c0_18 = arith.constant 0 : index
    %11 = vector.load %arg5[%c0_17, %c0_18] : memref<72x128xf32, #tpu.memory_space<vmem>>, vector<72x128xf32>
    %cst_19 = arith.constant dense<0.000000e+00> : vector<36x128xf32>
    %12 = tpu.matmul %10, %11, %cst_19 {dimension_numbers = #tpu.dot_dimension_numbers<[1], [0], [0], [1], [0, 0, 1, 1], [], []>} : vector<36x72xf32>, vector<72x128xf32>, vector<36x128xf32> -> vector<36x128xf32>
    %13 = arith.addf %8, %12 : vector<36x128xf32>
    %c0_20 = arith.constant 0 : index
    %c0_21 = arith.constant 0 : index
    %14 = vector.load %arg3[%c0_20, %c0_21] : memref<36x38xf32, #tpu.memory_space<vmem>>, vector<36x38xf32>
    %cst_22 = arith.constant dense<0.000000e+00> : vector<36x72xf32>
    %15 = tpu.matmul %14, %0, %cst_22 {dimension_numbers = #tpu.dot_dimension_numbers<[1], [0], [0], [1], [0, 0, 1, 1], [], []>} : vector<36x38xf32>, vector<38x72xf32>, vector<36x72xf32> -> vector<36x72xf32>
    %c0_23 = arith.constant 0 : index
    %c0_24 = arith.constant 0 : index
    %16 = vector.load %arg6[%c0_23, %c0_24] : memref<72x128xf32, #tpu.memory_space<vmem>>, vector<72x128xf32>
    %cst_25 = arith.constant dense<0.000000e+00> : vector<36x128xf32>
    %17 = tpu.matmul %15, %16, %cst_25 {dimension_numbers = #tpu.dot_dimension_numbers<[1], [0], [0], [1], [0, 0, 1, 1], [], []>} : vector<36x72xf32>, vector<72x128xf32>, vector<36x128xf32> -> vector<36x128xf32>
    %18 = arith.addf %13, %17 : vector<36x128xf32>
    %19 = vector.broadcast %1 : vector<36x1xf32> to vector<36x128xf32>
    %20 = arith.mulf %18, %19 : vector<36x128xf32>
    %cst_26 = arith.constant dense<0.000000e+00> : vector<36x128xf32>
    %21 = tpu.matmul %20, %2, %cst_26 {dimension_numbers = #tpu.dot_dimension_numbers<[1], [0], [0], [1], [0, 0, 1, 1], [], []>} : vector<36x128xf32>, vector<128x128xf32>, vector<36x128xf32> -> vector<36x128xf32>
    %cst_27 = arith.constant dense<0.000000e+00> : vector<128xf32>
    %22 = vector.multi_reduction <add>, %21, %cst_27 [0] : vector<36x128xf32> to vector<128xf32>
    %23 = vector.shape_cast %22 : vector<128xf32> to vector<1x128xf32>
    %24 = vector.broadcast %23 : vector<1x128xf32> to vector<36x128xf32>
    %25 = arith.subf %18, %24 : vector<36x128xf32>
    %26 = arith.mulf %25, %25 : vector<36x128xf32>
    %27 = vector.broadcast %1 : vector<36x1xf32> to vector<36x128xf32>
    %28 = arith.mulf %26, %27 : vector<36x128xf32>
    %cst_28 = arith.constant dense<0.000000e+00> : vector<36x128xf32>
    %29 = tpu.matmul %28, %2, %cst_28 {dimension_numbers = #tpu.dot_dimension_numbers<[1], [0], [0], [1], [0, 0, 1, 1], [], []>} : vector<36x128xf32>, vector<128x128xf32>, vector<36x128xf32> -> vector<36x128xf32>
    %cst_29 = arith.constant dense<0.000000e+00> : vector<128xf32>
    %30 = vector.multi_reduction <add>, %29, %cst_29 [0] : vector<36x128xf32> to vector<128xf32>
    %31 = vector.shape_cast %30 : vector<128xf32> to vector<1x128xf32>
    %cst_30 = arith.constant 9.99999974E-6 : f32
    %32 = vector.broadcast %cst_30 : f32 to vector<1x128xf32>
    %33 = arith.addf %31, %32 : vector<1x128xf32>
    %34 = math.rsqrt %33 : vector<1x128xf32>
    %35 = arith.mulf %3, %34 : vector<1x128xf32>
    %36 = vector.broadcast %35 : vector<1x128xf32> to vector<36x128xf32>
    %37 = arith.mulf %25, %36 : vector<36x128xf32>
    %38 = vector.broadcast %4 : vector<1x128xf32> to vector<36x128xf32>
    %39 = arith.addf %37, %38 : vector<36x128xf32>
    %cst_31 = arith.constant 0.000000e+00 : f32
    %40 = vector.broadcast %cst_31 : f32 to vector<36x128xf32>
    %41 = arith.maximumf %39, %40 : vector<36x128xf32>
    %c0_32 = arith.constant 0 : index
    %c0_33 = arith.constant 0 : index
    %42 = vector.load %arg11[%c0_32, %c0_33] : memref<22x36xf32, #tpu.memory_space<vmem>>, vector<22x36xf32>
    %cst_34 = arith.constant dense<0.000000e+00> : vector<22x128xf32>
    %43 = tpu.matmul %42, %41, %cst_34 {dimension_numbers = #tpu.dot_dimension_numbers<[1], [0], [0], [1], [0, 0, 1, 1], [], []>} : vector<22x36xf32>, vector<36x128xf32>, vector<22x128xf32> -> vector<22x128xf32>
    %c0_35 = arith.constant 0 : index
    %c0_36 = arith.constant 0 : index
    %44 = vector.load %arg13[%c0_35, %c0_36] : memref<128x80xf32, #tpu.memory_space<vmem>>, vector<128x80xf32>
    %cst_37 = arith.constant dense<0.000000e+00> : vector<22x80xf32>
    %45 = tpu.matmul %43, %44, %cst_37 {dimension_numbers = #tpu.dot_dimension_numbers<[1], [0], [0], [1], [0, 0, 1, 1], [], []>} : vector<22x128xf32>, vector<128x80xf32>, vector<22x80xf32> -> vector<22x80xf32>
    %c0_38 = arith.constant 0 : index
    %c0_39 = arith.constant 0 : index
    %46 = vector.load %arg14[%c0_38, %c0_39] : memref<128x80xf32, #tpu.memory_space<vmem>>, vector<128x80xf32>
    %cst_40 = arith.constant dense<0.000000e+00> : vector<22x80xf32>
    %47 = tpu.matmul %43, %46, %cst_40 {dimension_numbers = #tpu.dot_dimension_numbers<[1], [0], [0], [1], [0, 0, 1, 1], [], []>} : vector<22x128xf32>, vector<128x80xf32>, vector<22x80xf32> -> vector<22x80xf32>
    %48 = arith.maximumf %45, %47 : vector<22x80xf32>
    %c0_41 = arith.constant 0 : index
    %c0_42 = arith.constant 0 : index
    %49 = vector.load %arg12[%c0_41, %c0_42] : memref<22x36xf32, #tpu.memory_space<vmem>>, vector<22x36xf32>
    %cst_43 = arith.constant dense<0.000000e+00> : vector<22x128xf32>
    %50 = tpu.matmul %49, %41, %cst_43 {dimension_numbers = #tpu.dot_dimension_numbers<[1], [0], [0], [1], [0, 0, 1, 1], [], []>} : vector<22x36xf32>, vector<36x128xf32>, vector<22x128xf32> -> vector<22x128xf32>
    %c0_44 = arith.constant 0 : index
    %c0_45 = arith.constant 0 : index
    %51 = vector.load %arg13[%c0_44, %c0_45] : memref<128x80xf32, #tpu.memory_space<vmem>>, vector<128x80xf32>
    %cst_46 = arith.constant dense<0.000000e+00> : vector<22x80xf32>
    %52 = tpu.matmul %50, %51, %cst_46 {dimension_numbers = #tpu.dot_dimension_numbers<[1], [0], [0], [1], [0, 0, 1, 1], [], []>} : vector<22x128xf32>, vector<128x80xf32>, vector<22x80xf32> -> vector<22x80xf32>
    %53 = arith.maximumf %48, %52 : vector<22x80xf32>
    %c0_47 = arith.constant 0 : index
    %c0_48 = arith.constant 0 : index
    %54 = vector.load %arg14[%c0_47, %c0_48] : memref<128x80xf32, #tpu.memory_space<vmem>>, vector<128x80xf32>
    %cst_49 = arith.constant dense<0.000000e+00> : vector<22x80xf32>
    %55 = tpu.matmul %50, %54, %cst_49 {dimension_numbers = #tpu.dot_dimension_numbers<[1], [0], [0], [1], [0, 0, 1, 1], [], []>} : vector<22x128xf32>, vector<128x80xf32>, vector<22x80xf32> -> vector<22x80xf32>
    %56 = arith.maximumf %53, %55 : vector<22x80xf32>
    %c0_50 = arith.constant 0 : index
    %c0_51 = arith.constant 0 : index
    %57 = vector.load %arg21[%c0_50, %c0_51] : memref<20x1xf32, #tpu.memory_space<vmem>>, vector<20x1xf32>
    %c0_52 = arith.constant 0 : index
    %c0_53 = arith.constant 0 : index
    %58 = vector.load %arg22[%c0_52, %c0_53] : memref<64x64xf32, #tpu.memory_space<vmem>>, vector<64x64xf32>
    %c0_54 = arith.constant 0 : index
    %c0_55 = arith.constant 0 : index
    %59 = vector.load %arg23[%c0_54, %c0_55] : memref<1x64xf32, #tpu.memory_space<vmem>>, vector<1x64xf32>
    %c0_56 = arith.constant 0 : index
    %c0_57 = arith.constant 0 : index
    %60 = vector.load %arg24[%c0_56, %c0_57] : memref<1x64xf32, #tpu.memory_space<vmem>>, vector<1x64xf32>
    %c0_58 = arith.constant 0 : index
    %c0_59 = arith.constant 0 : index
    %61 = vector.load %arg15[%c0_58, %c0_59] : memref<20x22xf32, #tpu.memory_space<vmem>>, vector<20x22xf32>
    %cst_60 = arith.constant dense<0.000000e+00> : vector<20x80xf32>
    %62 = tpu.matmul %61, %56, %cst_60 {dimension_numbers = #tpu.dot_dimension_numbers<[1], [0], [0], [1], [0, 0, 1, 1], [], []>} : vector<20x22xf32>, vector<22x80xf32>, vector<20x80xf32> -> vector<20x80xf32>
    %c0_61 = arith.constant 0 : index
    %c0_62 = arith.constant 0 : index
    %63 = vector.load %arg18[%c0_61, %c0_62] : memref<80x64xf32, #tpu.memory_space<vmem>>, vector<80x64xf32>
    %cst_63 = arith.constant dense<0.000000e+00> : vector<20x64xf32>
    %64 = tpu.matmul %62, %63, %cst_63 {dimension_numbers = #tpu.dot_dimension_numbers<[1], [0], [0], [1], [0, 0, 1, 1], [], []>} : vector<20x80xf32>, vector<80x64xf32>, vector<20x64xf32> -> vector<20x64xf32>
    %c0_64 = arith.constant 0 : index
    %c0_65 = arith.constant 0 : index
    %65 = vector.load %arg16[%c0_64, %c0_65] : memref<20x22xf32, #tpu.memory_space<vmem>>, vector<20x22xf32>
    %cst_66 = arith.constant dense<0.000000e+00> : vector<20x80xf32>
    %66 = tpu.matmul %65, %56, %cst_66 {dimension_numbers = #tpu.dot_dimension_numbers<[1], [0], [0], [1], [0, 0, 1, 1], [], []>} : vector<20x22xf32>, vector<22x80xf32>, vector<20x80xf32> -> vector<20x80xf32>
    %c0_67 = arith.constant 0 : index
    %c0_68 = arith.constant 0 : index
    %67 = vector.load %arg19[%c0_67, %c0_68] : memref<80x64xf32, #tpu.memory_space<vmem>>, vector<80x64xf32>
    %cst_69 = arith.constant dense<0.000000e+00> : vector<20x64xf32>
    %68 = tpu.matmul %66, %67, %cst_69 {dimension_numbers = #tpu.dot_dimension_numbers<[1], [0], [0], [1], [0, 0, 1, 1], [], []>} : vector<20x80xf32>, vector<80x64xf32>, vector<20x64xf32> -> vector<20x64xf32>
    %69 = arith.addf %64, %68 : vector<20x64xf32>
    %c0_70 = arith.constant 0 : index
    %c0_71 = arith.constant 0 : index
    %70 = vector.load %arg17[%c0_70, %c0_71] : memref<20x22xf32, #tpu.memory_space<vmem>>, vector<20x22xf32>
    %cst_72 = arith.constant dense<0.000000e+00> : vector<20x80xf32>
    %71 = tpu.matmul %70, %56, %cst_72 {dimension_numbers = #tpu.dot_dimension_numbers<[1], [0], [0], [1], [0, 0, 1, 1], [], []>} : vector<20x22xf32>, vector<22x80xf32>, vector<20x80xf32> -> vector<20x80xf32>
    %c0_73 = arith.constant 0 : index
    %c0_74 = arith.constant 0 : index
    %72 = vector.load %arg20[%c0_73, %c0_74] : memref<80x64xf32, #tpu.memory_space<vmem>>, vector<80x64xf32>
    %cst_75 = arith.constant dense<0.000000e+00> : vector<20x64xf32>
    %73 = tpu.matmul %71, %72, %cst_75 {dimension_numbers = #tpu.dot_dimension_numbers<[1], [0], [0], [1], [0, 0, 1, 1], [], []>} : vector<20x80xf32>, vector<80x64xf32>, vector<20x64xf32> -> vector<20x64xf32>
    %74 = arith.addf %69, %73 : vector<20x64xf32>
    %75 = vector.broadcast %57 : vector<20x1xf32> to vector<20x64xf32>
    %76 = arith.mulf %74, %75 : vector<20x64xf32>
    %cst_76 = arith.constant dense<0.000000e+00> : vector<20x64xf32>
    %77 = tpu.matmul %76, %58, %cst_76 {dimension_numbers = #tpu.dot_dimension_numbers<[1], [0], [0], [1], [0, 0, 1, 1], [], []>} : vector<20x64xf32>, vector<64x64xf32>, vector<20x64xf32> -> vector<20x64xf32>
    %cst_77 = arith.constant dense<0.000000e+00> : vector<64xf32>
    %78 = vector.multi_reduction <add>, %77, %cst_77 [0] : vector<20x64xf32> to vector<64xf32>
    %79 = vector.shape_cast %78 : vector<64xf32> to vector<1x64xf32>
    %80 = vector.broadcast %79 : vector<1x64xf32> to vector<20x64xf32>
    %81 = arith.subf %74, %80 : vector<20x64xf32>
    %82 = arith.mulf %81, %81 : vector<20x64xf32>
    %83 = vector.broadcast %57 : vector<20x1xf32> to vector<20x64xf32>
    %84 = arith.mulf %82, %83 : vector<20x64xf32>
    %cst_78 = arith.constant dense<0.000000e+00> : vector<20x64xf32>
    %85 = tpu.matmul %84, %58, %cst_78 {dimension_numbers = #tpu.dot_dimension_numbers<[1], [0], [0], [1], [0, 0, 1, 1], [], []>} : vector<20x64xf32>, vector<64x64xf32>, vector<20x64xf32> -> vector<20x64xf32>
    %cst_79 = arith.constant dense<0.000000e+00> : vector<64xf32>
    %86 = vector.multi_reduction <add>, %85, %cst_79 [0] : vector<20x64xf32> to vector<64xf32>
    %87 = vector.shape_cast %86 : vector<64xf32> to vector<1x64xf32>
    %cst_80 = arith.constant 9.99999974E-6 : f32
    %88 = vector.broadcast %cst_80 : f32 to vector<1x64xf32>
    %89 = arith.addf %87, %88 : vector<1x64xf32>
    %90 = math.rsqrt %89 : vector<1x64xf32>
    %91 = arith.mulf %59, %90 : vector<1x64xf32>
    %92 = vector.broadcast %91 : vector<1x64xf32> to vector<20x64xf32>
    %93 = arith.mulf %81, %92 : vector<20x64xf32>
    %94 = vector.broadcast %60 : vector<1x64xf32> to vector<20x64xf32>
    %95 = arith.addf %93, %94 : vector<20x64xf32>
    %cst_81 = arith.constant 0.000000e+00 : f32
    %96 = vector.broadcast %cst_81 : f32 to vector<20x64xf32>
    %97 = arith.maximumf %95, %96 : vector<20x64xf32>
    %c0_82 = arith.constant 0 : index
    %c0_83 = arith.constant 0 : index
    %98 = vector.load %arg25[%c0_82, %c0_83] : memref<14x20xf32, #tpu.memory_space<vmem>>, vector<14x20xf32>
    %cst_84 = arith.constant dense<0.000000e+00> : vector<14x64xf32>
    %99 = tpu.matmul %98, %97, %cst_84 {dimension_numbers = #tpu.dot_dimension_numbers<[1], [0], [0], [1], [0, 0, 1, 1], [], []>} : vector<14x20xf32>, vector<20x64xf32>, vector<14x64xf32> -> vector<14x64xf32>
    %c0_85 = arith.constant 0 : index
    %c0_86 = arith.constant 0 : index
    %100 = vector.load %arg27[%c0_85, %c0_86] : memref<64x48xf32, #tpu.memory_space<vmem>>, vector<64x48xf32>
    %cst_87 = arith.constant dense<0.000000e+00> : vector<14x48xf32>
    %101 = tpu.matmul %99, %100, %cst_87 {dimension_numbers = #tpu.dot_dimension_numbers<[1], [0], [0], [1], [0, 0, 1, 1], [], []>} : vector<14x64xf32>, vector<64x48xf32>, vector<14x48xf32> -> vector<14x48xf32>
    %c0_88 = arith.constant 0 : index
    %c0_89 = arith.constant 0 : index
    %102 = vector.load %arg28[%c0_88, %c0_89] : memref<64x48xf32, #tpu.memory_space<vmem>>, vector<64x48xf32>
    %cst_90 = arith.constant dense<0.000000e+00> : vector<14x48xf32>
    %103 = tpu.matmul %99, %102, %cst_90 {dimension_numbers = #tpu.dot_dimension_numbers<[1], [0], [0], [1], [0, 0, 1, 1], [], []>} : vector<14x64xf32>, vector<64x48xf32>, vector<14x48xf32> -> vector<14x48xf32>
    %104 = arith.maximumf %101, %103 : vector<14x48xf32>
    %c0_91 = arith.constant 0 : index
    %c0_92 = arith.constant 0 : index
    %105 = vector.load %arg26[%c0_91, %c0_92] : memref<14x20xf32, #tpu.memory_space<vmem>>, vector<14x20xf32>
    %cst_93 = arith.constant dense<0.000000e+00> : vector<14x64xf32>
    %106 = tpu.matmul %105, %97, %cst_93 {dimension_numbers = #tpu.dot_dimension_numbers<[1], [0], [0], [1], [0, 0, 1, 1], [], []>} : vector<14x20xf32>, vector<20x64xf32>, vector<14x64xf32> -> vector<14x64xf32>
    %c0_94 = arith.constant 0 : index
    %c0_95 = arith.constant 0 : index
    %107 = vector.load %arg27[%c0_94, %c0_95] : memref<64x48xf32, #tpu.memory_space<vmem>>, vector<64x48xf32>
    %cst_96 = arith.constant dense<0.000000e+00> : vector<14x48xf32>
    %108 = tpu.matmul %106, %107, %cst_96 {dimension_numbers = #tpu.dot_dimension_numbers<[1], [0], [0], [1], [0, 0, 1, 1], [], []>} : vector<14x64xf32>, vector<64x48xf32>, vector<14x48xf32> -> vector<14x48xf32>
    %109 = arith.maximumf %104, %108 : vector<14x48xf32>
    %c0_97 = arith.constant 0 : index
    %c0_98 = arith.constant 0 : index
    %110 = vector.load %arg28[%c0_97, %c0_98] : memref<64x48xf32, #tpu.memory_space<vmem>>, vector<64x48xf32>
    %cst_99 = arith.constant dense<0.000000e+00> : vector<14x48xf32>
    %111 = tpu.matmul %106, %110, %cst_99 {dimension_numbers = #tpu.dot_dimension_numbers<[1], [0], [0], [1], [0, 0, 1, 1], [], []>} : vector<14x64xf32>, vector<64x48xf32>, vector<14x48xf32> -> vector<14x48xf32>
    %112 = arith.maximumf %109, %111 : vector<14x48xf32>
    %c0_100 = arith.constant 0 : index
    %c0_101 = arith.constant 0 : index
    %113 = vector.load %arg29[%c0_100, %c0_101] : memref<2x14xf32, #tpu.memory_space<vmem>>, vector<2x14xf32>
    %c0_102 = arith.constant 0 : index
    %c0_103 = arith.constant 0 : index
    %114 = vector.load %arg30[%c0_102, %c0_103] : memref<48x32xf32, #tpu.memory_space<vmem>>, vector<48x32xf32>
    %cst_104 = arith.constant dense<0.000000e+00> : vector<2x48xf32>
    %115 = tpu.matmul %113, %112, %cst_104 {dimension_numbers = #tpu.dot_dimension_numbers<[1], [0], [0], [1], [0, 0, 1, 1], [], []>} : vector<2x14xf32>, vector<14x48xf32>, vector<2x48xf32> -> vector<2x48xf32>
    %cst_105 = arith.constant dense<0.000000e+00> : vector<2x32xf32>
    %116 = tpu.matmul %115, %114, %cst_105 {dimension_numbers = #tpu.dot_dimension_numbers<[1], [0], [0], [1], [0, 0, 1, 1], [], []>} : vector<2x48xf32>, vector<48x32xf32>, vector<2x32xf32> -> vector<2x32xf32>
    %c0_106 = arith.constant 0 : index
    %c0_107 = arith.constant 0 : index
    %117 = vector.load %arg31[%c0_106, %c0_107] : memref<2x14xf32, #tpu.memory_space<vmem>>, vector<2x14xf32>
    %c0_108 = arith.constant 0 : index
    %c0_109 = arith.constant 0 : index
    %118 = vector.load %arg32[%c0_108, %c0_109] : memref<48x32xf32, #tpu.memory_space<vmem>>, vector<48x32xf32>
    %cst_110 = arith.constant dense<0.000000e+00> : vector<2x48xf32>
    %119 = tpu.matmul %117, %112, %cst_110 {dimension_numbers = #tpu.dot_dimension_numbers<[1], [0], [0], [1], [0, 0, 1, 1], [], []>} : vector<2x14xf32>, vector<14x48xf32>, vector<2x48xf32> -> vector<2x48xf32>
    %cst_111 = arith.constant dense<0.000000e+00> : vector<2x32xf32>
    %120 = tpu.matmul %119, %118, %cst_111 {dimension_numbers = #tpu.dot_dimension_numbers<[1], [0], [0], [1], [0, 0, 1, 1], [], []>} : vector<2x48xf32>, vector<48x32xf32>, vector<2x32xf32> -> vector<2x32xf32>
    %121 = arith.addf %116, %120 : vector<2x32xf32>
    %c0_112 = arith.constant 0 : index
    %c0_113 = arith.constant 0 : index
    %122 = vector.load %arg33[%c0_112, %c0_113] : memref<2x14xf32, #tpu.memory_space<vmem>>, vector<2x14xf32>
    %c0_114 = arith.constant 0 : index
    %c0_115 = arith.constant 0 : index
    %123 = vector.load %arg34[%c0_114, %c0_115] : memref<48x32xf32, #tpu.memory_space<vmem>>, vector<48x32xf32>
    %cst_116 = arith.constant dense<0.000000e+00> : vector<2x48xf32>
    %124 = tpu.matmul %122, %112, %cst_116 {dimension_numbers = #tpu.dot_dimension_numbers<[1], [0], [0], [1], [0, 0, 1, 1], [], []>} : vector<2x14xf32>, vector<14x48xf32>, vector<2x48xf32> -> vector<2x48xf32>
    %cst_117 = arith.constant dense<0.000000e+00> : vector<2x32xf32>
    %125 = tpu.matmul %124, %123, %cst_117 {dimension_numbers = #tpu.dot_dimension_numbers<[1], [0], [0], [1], [0, 0, 1, 1], [], []>} : vector<2x48xf32>, vector<48x32xf32>, vector<2x32xf32> -> vector<2x32xf32>
    %126 = arith.addf %121, %125 : vector<2x32xf32>
    %c0_118 = arith.constant 0 : index
    %c0_119 = arith.constant 0 : index
    %127 = vector.load %arg35[%c0_118, %c0_119] : memref<2x14xf32, #tpu.memory_space<vmem>>, vector<2x14xf32>
    %c0_120 = arith.constant 0 : index
    %c0_121 = arith.constant 0 : index
    %128 = vector.load %arg36[%c0_120, %c0_121] : memref<48x32xf32, #tpu.memory_space<vmem>>, vector<48x32xf32>
    %cst_122 = arith.constant dense<0.000000e+00> : vector<2x48xf32>
    %129 = tpu.matmul %127, %112, %cst_122 {dimension_numbers = #tpu.dot_dimension_numbers<[1], [0], [0], [1], [0, 0, 1, 1], [], []>} : vector<2x14xf32>, vector<14x48xf32>, vector<2x48xf32> -> vector<2x48xf32>
    %cst_123 = arith.constant dense<0.000000e+00> : vector<2x32xf32>
    %130 = tpu.matmul %129, %128, %cst_123 {dimension_numbers = #tpu.dot_dimension_numbers<[1], [0], [0], [1], [0, 0, 1, 1], [], []>} : vector<2x48xf32>, vector<48x32xf32>, vector<2x32xf32> -> vector<2x32xf32>
    %131 = arith.addf %126, %130 : vector<2x32xf32>
    %c0_124 = arith.constant 0 : index
    %c0_125 = arith.constant 0 : index
    %132 = vector.load %arg37[%c0_124, %c0_125] : memref<1x32xf32, #tpu.memory_space<vmem>>, vector<1x32xf32>
    %c0_126 = arith.constant 0 : index
    %c0_127 = arith.constant 0 : index
    %133 = vector.load %arg38[%c0_126, %c0_127] : memref<32x32xf32, #tpu.memory_space<vmem>>, vector<32x32xf32>
    %c0_128 = arith.constant 0 : index
    %c0_129 = arith.constant 0 : index
    %134 = vector.load %arg39[%c0_128, %c0_129] : memref<1x32xf32, #tpu.memory_space<vmem>>, vector<1x32xf32>
    %c0_130 = arith.constant 0 : index
    %c0_131 = arith.constant 0 : index
    %135 = vector.load %arg40[%c0_130, %c0_131] : memref<32x10xf32, #tpu.memory_space<vmem>>, vector<32x10xf32>
    %c0_132 = arith.constant 0 : index
    %c0_133 = arith.constant 0 : index
    %136 = vector.load %arg41[%c0_132, %c0_133] : memref<1x10xf32, #tpu.memory_space<vmem>>, vector<1x10xf32>
    %137 = vector.broadcast %132 : vector<1x32xf32> to vector<2x32xf32>
    %138 = arith.addf %131, %137 : vector<2x32xf32>
    %cst_134 = arith.constant dense<0.000000e+00> : vector<2x32xf32>
    %139 = tpu.matmul %138, %133, %cst_134 {dimension_numbers = #tpu.dot_dimension_numbers<[1], [0], [0], [1], [0, 0, 1, 1], [], []>} : vector<2x32xf32>, vector<32x32xf32>, vector<2x32xf32> -> vector<2x32xf32>
    %140 = vector.broadcast %134 : vector<1x32xf32> to vector<2x32xf32>
    %141 = arith.addf %139, %140 : vector<2x32xf32>
    %cst_135 = arith.constant dense<0.000000e+00> : vector<2x10xf32>
    %142 = tpu.matmul %141, %135, %cst_135 {dimension_numbers = #tpu.dot_dimension_numbers<[1], [0], [0], [1], [0, 0, 1, 1], [], []>} : vector<2x32xf32>, vector<32x10xf32>, vector<2x10xf32> -> vector<2x10xf32>
    %143 = vector.broadcast %136 : vector<1x10xf32> to vector<2x10xf32>
    %144 = arith.addf %142, %143 : vector<2x10xf32>
    %c0_136 = arith.constant 0 : index
    %c0_137 = arith.constant 0 : index
    %145 = vector.load %arg42[%c0_136, %c0_137] : memref<2x10xf32, #tpu.memory_space<vmem>>, vector<2x10xf32>
    tpu.vector_store %arg42[%c0_136, %c0_137], %144 {strides = array<i32>} : memref<2x10xf32, #tpu.memory_space<vmem>>, vector<2x10xf32>,
    return
  }
}

</mosaic_0001>

<bundles_post_ra>
// kernel: _forward.1
= control target key start
LH: loop header
LB: loop body
LE: loop exit
PB: predicated region body
PF: predicated region fallthrough
CT: control target
= control target key end

     0   :  { %s2063_s6 = smov 1   ;;  %s2064_s10 = smov 2   ;;  %s2698_s0 = inlined_call_operand.smem [shape: u32[43], index: -1, kind: input, shape index: {}] }
   0x1   :  { %s2115_s5 = sld [smem:[%s2698_s0]]   ;;  %s2065_s14 = smov 3  }
   0x2   :  { %s2120_s9 = sld [smem:[%s2698_s0 + %s2063_s6]]   ;;  %s2066_s18 = smov 4  }
   0x3   :  { %s2125_s13 = sld [smem:[%s2698_s0 + %s2064_s10]]   ;;  %s2067_s22 = smov 5  }
   0x4   :  { %s2130_s17 = sld [smem:[%s2698_s0 + %s2065_s14]]   ;;  %s2068_s26 = smov 6  }
   0x5   :  { %s2135_s21 = sld [smem:[%s2698_s0 + %s2066_s18]]   ;;  %s2069_s30 = smov 7  }
   0x6   :  { %s2140_s25 = sld [smem:[%s2698_s0 + %s2067_s22]]   ;;  %s2070_s4 = smov 8  }
   0x7   :  { %s2145_s29 = sld [smem:[%s2698_s0 + %s2068_s26]]   ;;  %s2071_s10 = smov 9  }
   0x8   :  { %s2150_s3 = sld [smem:[%s2698_s0 + %s2069_s30]]   ;;  %s2072_s15 = smov 10  }
   0x9   :  { %s2155_s8 = sld [smem:[%s2698_s0 + %s2070_s4]]   ;;  %s2073_s20 = smov 11  }
   0xa   :  { %s2160_s14 = sld [smem:[%s2698_s0 + %s2071_s10]]   ;;  %s2074_s26 = smov 12  }
   0xb   :  { %s2165_s19 = sld [smem:[%s2698_s0 + %s2072_s15]]   ;;  %s2075_s1 = smov 13  }
   0xc   :  { %s2170_s24 = sld [smem:[%s2698_s0 + %s2073_s20]]   ;;  %s2076_s7 = smov 14  }
   0xd   :  { %s2175_s30 = sld [smem:[%s2698_s0 + %s2074_s26]]   ;;  %s2077_s15 = smov 15  }
   0xe   :  { %s2180_s6 = sld [smem:[%s2698_s0 + %s2075_s1]]   ;;  %s2078_s22 = smov 16  }
   0xf   :  { %s2185_s12 = sld [smem:[%s2698_s0 + %s2076_s7]]   ;;  %s2079_s28 = smov 17  }
  0x10   :  { %s2190_s20 = sld [smem:[%s2698_s0 + %s2077_s15]]   ;;  %s2080_s7 = smov 18  }
  0x11   :  { %s2195_s27 = sld [smem:[%s2698_s0 + %s2078_s22]]   ;;  %s2081_s15 = smov 19  }
  0x12   :  { %2717 = sst [smem:[#allocation5_spill]] %s2170_s24  ;;  %s2082_s22 = smov 20  }
  0x13   :  { %2718 = sst [smem:[#allocation6_spill]] %s2175_s30 }
  0x14   :  { %s2200_s4 = sld [smem:[%s2698_s0 + %s2079_s28]]   ;;  %s2083_s28 = smov 21  }
  0x15   :  { %s2205_s30 = sld [smem:[%s2698_s0 + %s2080_s7]]   ;;  %s2084_s7 = smov 22  }
  0x16   :  { %2719 = sst [smem:[#allocation7_spill]] %s2190_s20 }
  0x17   :  { %2720 = sst [smem:[#allocation8_spill]] %s2195_s27 }
  0x18   :  { %s2210_s20 = sld [smem:[%s2698_s0 + %s2081_s15]]   ;;  %s2085_s15 = smov 23  }
  0x19   :  { %s2215_s27 = sld [smem:[%s2698_s0 + %s2082_s22]]   ;;  %s2086_s22 = smov 24  }
  0x1a   :  { %2721 = sst [smem:[#allocation9_spill]] %s2200_s4 }
  0x1b   :  { %2722 = sst [smem:[#allocation10_spill]] %s2205_s30 }
  0x1c   :  { %s2220_s4 = sld [smem:[%s2698_s0 + %s2083_s28]]   ;;  %s2087_s28 = smov 25  }
  0x1d   :  { %s2225_s30 = sld [smem:[%s2698_s0 + %s2084_s7]]   ;;  %s2088_s7 = smov 26  }
  0x1e   :  { %2723 = sst [smem:[#allocation11_spill]] %s2210_s20 }
  0x1f   :  { %2724 = sst [smem:[#allocation12_spill]] %s2215_s27 }
  0x20   :  { %s2230_s20 = sld [smem:[%s2698_s0 + %s2085_s15]]   ;;  %s2089_s15 = smov 27  }
  0x21   :  { %s2235_s27 = sld [smem:[%s2698_s0 + %s2086_s22]]   ;;  %s2090_s22 = smov 28  }
  0x22   :  { %s2240_s24 = sld [smem:[%s2698_s0 + %s2087_s28]]   ;;  %s2091_s28 = smov 29  }
  0x23   :  { %2725 = sst [smem:[#allocation13_spill]] %s2225_s30 }
  0x24   :  { %s2245_s30 = sld [smem:[%s2698_s0 + %s2088_s7]]   ;;  %s2092_s7 = smov 30  }
  0x26   :  { %2726 = sst [smem:[#allocation14_spill]] %s2230_s20 }
  0x27   :  { %2727 = sst [smem:[#allocation15_spill]] %s2235_s27 }
  0x28   :  { %2728 = sst [smem:[#allocation16_spill]] %s2240_s24 }
  0x29   :  { %s2250_s20 = sld [smem:[%s2698_s0 + %s2089_s15]]   ;;  %s2093_s15 = smov 31  }
  0x2a   :  { %2729 = sst [smem:[#allocation17_spill]] %s2245_s30 }
  0x2b   :  { %s2255_s27 = sld [smem:[%s2698_s0 + %s2090_s22]]   ;;  %s2094_s22 = smov 32  }
  0x2c   :  { %s2260_s24 = sld [smem:[%s2698_s0 + %s2091_s28]]   ;;  %s2095_s28 = smov 33  }
  0x2d   :  { %s2265_s30 = sld [smem:[%s2698_s0 + %s2092_s7]]   ;;  %s2096_s7 = smov 34  }
  0x2f   :  { %2730 = sst [smem:[#allocation18_spill]] %s2250_s20 }
  0x30   :  { %s2270_s20 = sld [smem:[%s2698_s0 + %s2093_s15]]   ;;  %s2097_s15 = smov 35  }
  0x31   :  { %2731 = sst [smem:[#allocation19_spill]] %s2255_s27 }
  0x32   :  { %2732 = sst [smem:[#allocation20_spill]] %s2260_s24 }
  0x33   :  { %2733 = sst [smem:[#allocation21_spill]] %s2265_s30 }
  0x34   :  { %s2275_s27 = sld [smem:[%s2698_s0 + %s2094_s22]]   ;;  %s2098_s22 = smov 36  }
  0x35   :  { %s2280_s24 = sld [smem:[%s2698_s0 + %s2095_s28]]   ;;  %s2099_s28 = smov 37  }
  0x36   :  { %2734 = sst [smem:[#allocation22_spill]] %s2270_s20 }
  0x37   :  { %s2285_s30 = sld [smem:[%s2698_s0 + %s2096_s7]]   ;;  %s2100_s7 = smov 38  }
  0x38   :  { %s2290_s20 = sld [smem:[%s2698_s0 + %s2097_s15]]   ;;  %s2101_s15 = smov 39  }
  0x3a   :  { %2735 = sst [smem:[#allocation23_spill]] %s2275_s27 }
  0x3b   :  { %2736 = sst [smem:[#allocation24_spill]] %s2280_s24 }
  0x3c   :  { %s2295_s27 = sld [smem:[%s2698_s0 + %s2098_s22]]   ;;  %s2102_s22 = smov 40  }
  0x3d   :  { %2737 = sst [smem:[#allocation25_spill]] %s2285_s30 }
  0x3e   :  { %2738 = sst [smem:[#allocation26_spill]] %s2290_s20 }
  0x3f   :  { %s2300_s24 = sld [smem:[%s2698_s0 + %s2099_s28]]   ;;  %s2103_s28 = smov 41  }
  0x40   :  { %s2305_s30 = sld [smem:[%s2698_s0 + %s2100_s7]]   ;;  %s2104_s7 = smov 42  }
  0x41   :  { %s2310_s20 = sld [smem:[%s2698_s0 + %s2101_s15]]  }
  0x42   :  { %2739 = sst [smem:[#allocation27_spill]] %s2295_s27 }
  0x43   :  { %s2315_s27 = sld [smem:[%s2698_s0 + %s2102_s22]]  }
  0x45   :  { %2740 = sst [smem:[#allocation28_spill]] %s2300_s24 }
  0x46   :  { %2741 = sst [smem:[#allocation29_spill]] %s2305_s30 }
  0x47   :  { %s2320_s24 = sld [smem:[%s2698_s0 + %s2103_s28]]  }
  0x48   :  { %s2325_s30 = sld [smem:[%s2698_s0 + %s2104_s7]]  }
  0x49   :  { %v179_v0 = vld [vmem:[%s2115_s5 + $0x20] sm:$0x3f]  ;;  %vm224_vm0 = vcmask 1045504   ;;  %v178_v1 = vld [vmem:[%s2115_s5 + $0x18] sm:$0xff]  ;;  %v177_v2 = vld [vmem:[%s2115_s5 + $0x10] sm:$0xff] }
  0x4a   :  { %1885 = vmatpush.msk.msra.mxu0 %vm224_vm0, %v179_v0  ;;  %1891 = vmatpush.msk.msra.mxu1 %vm224_vm0, %v179_v0  ;;  %v176_v3 = vld [vmem:[%s2115_s5 + $0x8] sm:$0xff]  ;;  %v175_v4 = vld [vmem:[%s2115_s5] sm:$0xff] }
  0x4c   :  { %240 = vmatpush.msra.mxu0 %v178_v1  ;;  %301 = vmatpush.msra.mxu1 %v178_v1 }
  0x4e   :  { %241 = vmatpush.msra.mxu0 %v177_v2  ;;  %302 = vmatpush.msra.mxu1 %v177_v2 }
  0x4f   :  { %90 = vsyncpa [#allocation3], 0  ;;  %v203_v5 = vld [vmem:[%s2120_s9] sm:$0xff]  ;;  %vm208_vm1 = vcmask 310272   ;;  %v204_v7 = vld [vmem:[%s2120_s9 + $0x8] sm:$0xff]  ;;  %vm330_vm2 = vcmask 588800  }
  0x50   :  { %242 = vmatpush.msra.mxu0 %v176_v3  ;;  %303 = vmatpush.msra.mxu1 %v176_v3  ;;  %v269_v6 = vld [vmem:[%s2125_s13] sm:$0xff]  ;;  %v270_v8 = vld [vmem:[%s2125_s13 + $0x8] sm:$0xff]  ;;  %v205_v9 = vld [vmem:[%s2120_s9 + $0x10] sm:$0xff]  ;;  %v2105_v48 = vmov 0   ;;  %vm603_vm3 = vcmask 1043456   ;;  %s2742_s0 = sld [smem:[#allocation5_spill]] }
  0x51   :  { %v271_v10 = vld [vmem:[%s2125_s13 + $0x10] sm:$0xff]  ;;  %v206_v11 = vld [vmem:[%s2120_s9 + $0x18] sm:$0xff]  ;;  %v207_v13 = vld [vmem:[%s2120_s9 + $0x20] sm:$0xf]  ;;  %2025 = vset.pattern.permute.xlu0 %v2105_v48  ;;  %2026 = vset.pattern.permute.xlu1 %v2105_v48  ;;  %s2743_s5 = sld [smem:[#allocation6_spill]]  ;;  %vm706_vm7 = vcmask 293888  }
  0x52   :  { %243 = vmatpush.msra.mxu0 %v175_v4  ;;  %304 = vmatpush.msra.mxu1 %v175_v4  ;;  %v272_v12 = vld [vmem:[%s2125_s13 + $0x18] sm:$0xff]  ;;  %v273_v14 = vld [vmem:[%s2125_s13 + $0x20] sm:$0xf]  ;;  %v327_v20 = vld [vmem:[%s2140_s25 + $0x30] sm:$0xff]  ;;  %s2744_s9 = sld [smem:[#allocation7_spill]]  ;;  %vm944_vm8 = vcmask 179200  }
  0x53   :  { %1886 = vmatmul.msk.f32.vlgmr.msra.gmra.mxu0 %vm208_vm1, %v203_v5  ;;  %1892 = vmatmul.msk.f32.vlgmr.msra.gmra.mxu1 %vm208_vm1, %v269_v6  ;;  %v425_v15 = vld [vmem:[%s2130_s17] sm:$0xff]  ;;  %v328_v18 = vld [vmem:[%s2140_s25 + $0x38] sm:$0xff]  ;;  %v266_v21 = vld [vmem:[%s2135_s21 + $0x30] sm:$0xff]  ;;  %s2745_s13 = sld [smem:[#allocation8_spill]]  ;;  %vm1041_vm9 = vcmask 654336   ;;  %vm1216_vm10 = vcmask 523264  }
  0x54   :  { %1907 = vmatpush.msk.msrb.mxu0 %vm224_vm0, %v179_v0  ;;  %v329_v16 = vld [vmem:[%s2140_s25 + $0x40] sm:$0xff]  ;;  %v267_v19 = vld [vmem:[%s2135_s21 + $0x38] sm:$0xff]  ;;  %v326_v22 = vld [vmem:[%s2140_s25 + $0x28] sm:$0xff]  ;;  %2027 = vset.pattern.permute.xlu2 %v2105_v48  ;;  %vm1255_vm11 = vcmask 519168   ;;  %vm1348_vm15 = vcmask 162816   ;;  %s2757_s15 = sld [smem:[#allocation23_spill]] }
  0x55   :  { %v268_v17 = vld [vmem:[%s2135_s21 + $0x40] sm:$0xff]  ;;  %353 = vmatpush.msra.mxu2 %v329_v16  ;;  %v265_v23 = vld [vmem:[%s2135_s21 + $0x28] sm:$0xff]  ;;  %v324_v27 = vld [vmem:[%s2140_s25 + $0x18] sm:$0xff]  ;;  %s2758_s16 = sld [smem:[#allocation22_spill]]  ;;  %s2106_s10 = smov [#allocation2]  }
  0x56   :  { %457 = vmatpush.msrb.mxu0 %v178_v1  ;;  %400 = vmatpush.msra.mxu3 %v268_v17  ;;  %v426_v24 = vld [vmem:[%s2130_s17 + $0x8] sm:$0xff]  ;;  %v325_v25 = vld [vmem:[%s2140_s25 + $0x20] sm:$0xff]  ;;  %v263_v28 = vld [vmem:[%s2135_s21 + $0x18] sm:$0xff]  ;;  %s2759_s18 = sld [smem:[#allocation20_spill]]  ;;  %s1832_s11 = sshll.u32 %s2106_s10, 4  ;;  %s1833_s11 = int_to_ptr.vmem [resolvable:$true] %s1832_s11 }
  0x57   :  { %354 = vmatpush.msra.mxu2 %v328_v18  ;;  %v264_v26 = vld [vmem:[%s2135_s21 + $0x20] sm:$0xff]  ;;  %v323_v29 = vld [vmem:[%s2140_s25 + $0x10] sm:$0xff]  ;;  %v322_v31 = vld [vmem:[%s2140_s25 + $0x8] sm:$0xff]  ;;  %s2760_s22 = sld [smem:[#allocation24_spill]] }
  0x58   :  { %458 = vmatpush.msrb.mxu0 %v177_v2  ;;  %401 = vmatpush.msra.mxu3 %v267_v19  ;;  %v262_v30 = vld [vmem:[%s2135_s21 + $0x10] sm:$0xff]  ;;  %v261_v32 = vld [vmem:[%s2135_s21 + $0x8] sm:$0xff]  ;;  %v428_v34 = vld [vmem:[%s2130_s17 + $0x18] sm:$0xff]  ;;  %s2761_s23 = sld [smem:[#allocation21_spill]] }
  0x59   :  { %355 = vmatpush.msra.mxu2 %v327_v20  ;;  %v427_v33 = vld [vmem:[%s2130_s17 + $0x10] sm:$0xff]  ;;  %v429_v35 = vld [vmem:[%s2130_s17 + $0x20] sm:$0xf]  ;;  %v484_v39 = vld [vmem:[%s2145_s29 + $0x38] sm:$0xff]  ;;  %s2746_s17 = sld [smem:[#allocation11_spill]] }
  0x5a   :  { %459 = vmatpush.msrb.mxu0 %v176_v3  ;;  %402 = vmatpush.msra.mxu3 %v266_v21  ;;  %v321_v36 = vld [vmem:[%s2140_s25] sm:$0xff]  ;;  %v483_v40 = vld [vmem:[%s2145_s29 + $0x30] sm:$0xff]  ;;  %v482_v41 = vld [vmem:[%s2145_s29 + $0x28] sm:$0xff]  ;;  %s2748_s25 = sld [smem:[#allocation9_spill]] }
  0x5b   :  { %1887 = vmatmul.msk.f32.gmra.mxu0 %vm208_vm1, %v204_v7  ;;  %1893 = vmatmul.msk.f32.gmra.mxu1 %vm208_vm1, %v270_v8  ;;  %v260_v37 = vld [vmem:[%s2135_s21] sm:$0xff]  ;;  %v480_v45 = vld [vmem:[%s2145_s29 + $0x18] sm:$0xff]  ;;  %v479_v46 = vld [vmem:[%s2145_s29 + $0x10] sm:$0xff]  ;;  %s2747_s21 = sld [smem:[#allocation10_spill]] }
  0x5c   :  { %460 = vmatpush.msrb.mxu0 %v175_v4  ;;  %356 = vmatpush.msra.mxu2 %v326_v22  ;;  %v485_v38 = vld [vmem:[%s2145_s29 + $0x40] sm:$0xff]  ;;  %v478_v49 = vld [vmem:[%s2145_s29 + $0x8] sm:$0xff]  ;;  %v182_v56 = vld [vmem:[%s2150_s3 + $0x10] sm:$0xff]  ;;  %s2762_s26 = sld [smem:[#allocation25_spill]] }
  0x5d   :  { %403 = vmatpush.msra.mxu3 %v265_v23  ;;  %508 = vmatpush.msrb.mxu1 %v485_v38  ;;  %v481_v42 = vld [vmem:[%s2145_s29 + $0x20] sm:$0xff]  ;;  %v181_v53 = vld [vmem:[%s2150_s3 + $0x8] sm:$0xff]  ;;  %v183_v60 = vld [vmem:[%s2150_s3 + $0x18] sm:$0xff]  ;;  %s2763_s28 = sld [smem:[#allocation27_spill]] }
  0x5e   :  { %357 = vmatpush.msra.mxu2 %v325_v25  ;;  %v180_v47 = vld [vmem:[%s2150_s3] sm:$0xff]  ;;  %v929_v57 = vld [vmem:[%s2220_s4 + $0x8] sm:$0xff]  ;;  %550 = vperm.xlu1 %2026, %v182_v56   ;;  %v930_v63 = vld [vmem:[%s2220_s4 + $0x10] sm:$0xf]  ;;  %s2764_s1 = sld [smem:[#allocation26_spill]] }
  0x5f   :  { %404 = vmatpush.msra.mxu3 %v264_v26  ;;  %509 = vmatpush.msrb.mxu1 %v484_v39  ;;  %v477_v50 = vld [vmem:[%s2145_s29] sm:$0xff]  ;;  %v200_v7 = vld [vmem:[%s2155_s8 + $0x78] sm:$0xff]  ;;  %v199_v8 = vld [vmem:[%s2155_s8 + $0x70] sm:$0xff]  ;;  %s2749_s29 = sld [smem:[#allocation12_spill]] }
  0x60   :  { %358 = vmatpush.msra.mxu2 %v324_v27  ;;  %540 = vperm.xlu0 %2025, %v180_v47   ;;  %v184_v1 = vld [vmem:[%s2150_s3 + $0x20] sm:$0xf]  ;;  %v191_v16 = vld [vmem:[%s2155_s8 + $0x30] sm:$0xff]  ;;  %v190_v17 = vld [vmem:[%s2155_s8 + $0x28] sm:$0xff]  ;;  %s2750_s3 = sld [smem:[#allocation13_spill]] }
  0x61   :  { %405 = vmatpush.msra.mxu3 %v263_v28  ;;  %510 = vmatpush.msrb.mxu1 %v483_v40  ;;  %v928_v2 = vld [vmem:[%s2220_s4] sm:$0xff]  ;;  %v188_v19 = vld [vmem:[%s2155_s8 + $0x18] sm:$0xff]  ;;  %v187_v20 = vld [vmem:[%s2155_s8 + $0x10] sm:$0xff]  ;;  %s2756_s4 = sld [smem:[#allocation17_spill]] }
  0x62   :  { %359 = vmatpush.msra.mxu2 %v323_v29  ;;  %560 = vperm.xlu2 %2027, %v184_v1   ;;  %v189_v18 = vld [vmem:[%s2155_s8 + $0x20] sm:$0xff]  ;;  %v186_v21 = vld [vmem:[%s2155_s8 + $0x8] sm:$0xff]  ;;  %s2765_s2 = sld [smem:[#allocation29_spill]] }
  0x63   :  { %1888 = vmatmul.msk.f32.gmra.mxu0 %vm208_vm1, %v205_v9  ;;  %1894 = vmatmul.msk.f32.gmra.mxu1 %vm208_vm1, %v271_v10  ;;  %v198_v9 = vld [vmem:[%s2155_s8 + $0x68] sm:$0xff]  ;;  %v197_v10 = vld [vmem:[%s2155_s8 + $0x60] sm:$0xff]  ;;  %s2766_s7 = sld [smem:[#allocation28_spill]] }
  0x64   :  { %406 = vmatpush.msra.mxu3 %v262_v30  ;;  %360 = vmatpush.msra.mxu2 %v322_v31  ;;  %v185_v22 = vld [vmem:[%s2155_s8] sm:$0xff] }
  0x65   :  { %511 = vmatpush.msrb.mxu1 %v482_v41 }
  0x66   :  { %407 = vmatpush.msra.mxu3 %v261_v32  ;;  %361 = vmatpush.msra.mxu2 %v321_v36 }
  0x67   :  { %512 = vmatpush.msrb.mxu1 %v481_v42  ;;  %555 = vperm.xlu1 %2026, %v183_v60  }
  0x68   :  { %408 = vmatpush.msra.mxu3 %v260_v37  ;;  %545 = vperm.xlu0 %2025, %v181_v53  }
  0x69   :  { %513 = vmatpush.msrb.mxu1 %v480_v45  ;;  %568 = vmatpush.msrb.mxu2 %v200_v7 }
  0x6a   :  { %1200 = vperm.xlu2 %2027, %v928_v2   ;;  %627 = vmatpush.msrb.mxu3 %v200_v7 }
  0x6b   :  { %1889 = vmatmul.msk.f32.gmra.mxu0 %vm208_vm1, %v206_v11  ;;  %1895 = vmatmul.msk.f32.gmra.mxu1 %vm208_vm1, %v272_v12  ;;  %v196_v11 = vld [vmem:[%s2155_s8 + $0x58] sm:$0xff]  ;;  %v195_v12 = vld [vmem:[%s2155_s8 + $0x50] sm:$0xff] }
  0x6c   :  { %514 = vmatpush.msrb.mxu1 %v479_v46  ;;  %569 = vmatpush.msrb.mxu2 %v199_v8 }
  0x6d   :  { %628 = vmatpush.msrb.mxu3 %v199_v8 }
  0x6e   :  { %515 = vmatpush.msrb.mxu1 %v478_v49  ;;  %570 = vmatpush.msrb.mxu2 %v198_v9 }
  0x6f   :  { %1210 = vperm.xlu1 %2026, %v930_v63   ;;  %629 = vmatpush.msrb.mxu3 %v198_v9 }
  0x70   :  { %516 = vmatpush.msrb.mxu1 %v477_v50  ;;  %1205 = vperm.xlu0 %2025, %v929_v57  }
  0x71   :  { %571 = vmatpush.msrb.mxu2 %v197_v10  ;;  %630 = vmatpush.msrb.mxu3 %v197_v10 }
  0x73   :  { %1890 = vmatmul.msk.f32.gmra.mxu0 %vm208_vm1, %v207_v13  ;;  %1896 = vmatmul.msk.f32.gmra.mxu1 %vm208_vm1, %v273_v14  ;;  %v194_v13 = vld [vmem:[%s2155_s8 + $0x48] sm:$0xff]  ;;  %v193_v14 = vld [vmem:[%s2155_s8 + $0x40] sm:$0xff] }
  0x74   :  { %572 = vmatpush.msrb.mxu2 %v196_v11  ;;  %631 = vmatpush.msrb.mxu3 %v196_v11 }
  0x76   :  { %573 = vmatpush.msrb.mxu2 %v195_v12  ;;  %632 = vmatpush.msrb.mxu3 %v195_v12 }
  0x78   :  { %574 = vmatpush.msrb.mxu2 %v194_v13  ;;  %633 = vmatpush.msrb.mxu3 %v194_v13 }
  0x7a   :  { %575 = vmatpush.msrb.mxu2 %v193_v14  ;;  %634 = vmatpush.msrb.mxu3 %v193_v14 }
  0x7b   :  { %1908 = vmatmul.msk.f32.vlgmr.msrb.gmra.mxu0 %vm208_vm1, %v425_v15  ;;  %v192_v15 = vld [vmem:[%s2155_s8 + $0x38] sm:$0xff]  ;;  %s2751_s8 = sld [smem:[#allocation18_spill]] }
  0x7c   :  { %576 = vmatpush.msrb.mxu2 %v192_v15  ;;  %635 = vmatpush.msrb.mxu3 %v192_v15 }
  0x7e   :  { %577 = vmatpush.msrb.mxu2 %v191_v16  ;;  %636 = vmatpush.msrb.mxu3 %v191_v16 }
  0x80   :  { %578 = vmatpush.msrb.mxu2 %v190_v17  ;;  %637 = vmatpush.msrb.mxu3 %v190_v17 }
  0x82   :  { %579 = vmatpush.msrb.mxu2 %v189_v18  ;;  %638 = vmatpush.msrb.mxu3 %v189_v18 }
  0x83   :  { %1909 = vmatmul.msk.f32.gmra.mxu0 %vm208_vm1, %v426_v24 }
  0x84   :  { %580 = vmatpush.msrb.mxu2 %v188_v19  ;;  %639 = vmatpush.msrb.mxu3 %v188_v19 }
  0x86   :  { %581 = vmatpush.msrb.mxu2 %v187_v20  ;;  %640 = vmatpush.msrb.mxu3 %v187_v20 }
  0x88   :  { %582 = vmatpush.msrb.mxu2 %v186_v21  ;;  %641 = vmatpush.msrb.mxu3 %v186_v21 }
  0x8a   :  { %583 = vmatpush.msrb.mxu2 %v185_v22  ;;  %642 = vmatpush.msrb.mxu3 %v185_v22 }
  0x8b   :  { %1910 = vmatmul.msk.f32.gmra.mxu0 %vm208_vm1, %v427_v33 }
  0x93   :  { %1911 = vmatmul.msk.f32.gmra.mxu0 %vm208_vm1, %v428_v34 }
  0x9b   :  { %1912 = vmatmul.msk.f32.gmra.mxu0 %vm208_vm1, %v429_v35  ;;  %vm1545_vm1 = vcmask 113664  }
  0xbc   :  { %v561_v56 = vpop.permute.xlu2 %560 }
  0xd0   :  { %v245_v43 = vpop.f32.mrf.mxu0  ;;  %v306_v44 = vpop.f32.mrf.mxu1 }
  0xd1   :  { %1897 = vmatmul.msk.f32.vlgmr.msra.gmra.mxu2 %vm330_vm2, %v306_v44  ;;  %1902 = vmatmul.msk.f32.vlgmr.msra.gmra.mxu3 %vm330_vm2, %v245_v43  ;;  %v551_v40 = vpop.permute.xlu1 %550 }
  0xd2   :  { %v541_v28 = vpop.permute.xlu0 %540 }
  0xd8   :  { %v248_v51 = vpop.f32.mrf.mxu0  ;;  %v309_v52 = vpop.f32.mrf.mxu1 }
  0xd9   :  { %1898 = vmatmul.msk.f32.gmra.mxu2 %vm330_vm2, %v309_v52  ;;  %1903 = vmatmul.msk.f32.gmra.mxu3 %vm330_vm2, %v248_v51  ;;  %v556_v49 = vpop.permute.xlu1 %555 }
  0xda   :  { %v546_v37 = vpop.permute.xlu0 %545 }
  0xe0   :  { %v251_v54 = vpop.f32.mrf.mxu0  ;;  %v312_v55 = vpop.f32.mrf.mxu1 }
  0xe1   :  { %1899 = vmatmul.msk.f32.gmra.mxu2 %vm330_vm2, %v312_v55  ;;  %1904 = vmatmul.msk.f32.gmra.mxu3 %vm330_vm2, %v251_v54 }
  0xe8   :  { %v254_v58 = vpop.f32.mrf.mxu0  ;;  %v315_v59 = vpop.f32.mrf.mxu1 }
  0xe9   :  { %1900 = vmatmul.msk.f32.gmra.mxu2 %vm330_vm2, %v315_v59  ;;  %1905 = vmatmul.msk.f32.gmra.mxu3 %vm330_vm2, %v254_v58 }
  0xf0   :  { %v257_v61 = vpop.f32.mrf.mxu0  ;;  %v318_v62 = vpop.f32.mrf.mxu1 }
  0xf1   :  { %1901 = vmatmul.msk.f32.gmra.mxu2 %vm330_vm2, %v318_v62  ;;  %1906 = vmatmul.msk.f32.gmra.mxu3 %vm330_vm2, %v257_v61 }
  0xf8   :  { %v462_v0 = vpop.f32.mrf.mxu0 }
  0xf9   :  { %1913 = vmatmul.msk.f32.vlgmr.msrb.gmra.mxu1 %vm330_vm2, %v462_v0 }
 0x100   :  { %v465_v3 = vpop.f32.mrf.mxu0 }
 0x101   :  { %1914 = vmatmul.msk.f32.gmra.mxu1 %vm330_vm2, %v465_v3 }
 0x108   :  { %v468_v4 = vpop.f32.mrf.mxu0 }
 0x109   :  { %1915 = vmatmul.msk.f32.gmra.mxu1 %vm330_vm2, %v468_v4 }
 0x110   :  { %v471_v5 = vpop.f32.mrf.mxu0 }
 0x111   :  { %1916 = vmatmul.msk.f32.gmra.mxu1 %vm330_vm2, %v471_v5 }
 0x118   :  { %v474_v6 = vpop.f32.mrf.mxu0 }
 0x119   :  { %1917 = vmatmul.msk.f32.gmra.mxu1 %vm330_vm2, %v474_v6  ;;  %vm1775_vm2 = vcmask 261120  }
 0x154   :  { %v363_v23 = vpop.f32.mrf.mxu2  ;;  %v410_v24 = vpop.f32.mrf.mxu3 }
 0x155   :  { %v411_v27 = vadd.f32 %v410_v24, %v363_v23 }
 0x15c   :  { %v366_v25 = vpop.f32.mrf.mxu2  ;;  %v413_v26 = vpop.f32.mrf.mxu3 }
 0x15d   :  { %v414_v32 = vadd.f32 %v413_v26, %v366_v25 }
 0x164   :  { %v369_v33 = vpop.f32.mrf.mxu2  ;;  %v416_v34 = vpop.f32.mrf.mxu3 }
 0x165   :  { %v417_v39 = vadd.f32 %v416_v34, %v369_v33 }
 0x16c   :  { %v372_v43 = vpop.f32.mrf.mxu2  ;;  %v419_v44 = vpop.f32.mrf.mxu3 }
 0x16d   :  { %v420_v46 = vadd.f32 %v419_v44, %v372_v43 }
 0x174   :  { %v375_v51 = vpop.f32.mrf.mxu2  ;;  %v422_v52 = vpop.f32.mrf.mxu3 }
 0x175   :  { %v423_v53 = vadd.f32 %v422_v52, %v375_v51  ;;  %v2028_v52 = vld [vmem:[%s2165_s19] ss:$0 sm:$0xff]  ;;  %s2753_s19 = sld [smem:[#allocation15_spill]] }
 0x176   :  { %v518_v29 = vpop.f32.mrf.mxu1 }
 0x177   :  { %v533_v30 = vadd.f32 %v518_v29, %v411_v27 }
 0x179   :  { %v563_v31 = vmul.f32 %v541_v28, %v533_v30 }
 0x17b   :  { %584 = vmatmul.f32.vlgmr.msrb.gmra.mxu2 %v563_v31 }
 0x17e   :  { %v521_v35 = vpop.f32.mrf.mxu1 }
 0x17f   :  { %v534_v36 = vadd.f32 %v521_v35, %v414_v32 }
 0x181   :  { %v564_v38 = vmul.f32 %v546_v37, %v534_v36 }
 0x183   :  { %587 = vmatmul.f32.gmra.mxu2 %v564_v38 }
 0x186   :  { %v524_v41 = vpop.f32.mrf.mxu1 }
 0x187   :  { %v535_v42 = vadd.f32 %v524_v41, %v417_v39 }
 0x189   :  { %v565_v45 = vmul.f32 %v551_v40, %v535_v42 }
 0x18b   :  { %590 = vmatmul.f32.gmra.mxu2 %v565_v45 }
 0x18e   :  { %v527_v47 = vpop.f32.mrf.mxu1 }
 0x18f   :  { %v536_v48 = vadd.f32 %v527_v47, %v420_v46  ;;  %v201_v47 = vld [vmem:[%s2160_s14] sm:$0x1]  ;;  %s2752_s14 = sld [smem:[#allocation14_spill]] }
 0x191   :  { %v566_v50 = vmul.f32 %v556_v49, %v536_v48 }
 0x193   :  { %593 = vmatmul.f32.gmra.mxu2 %v566_v50 }
 0x196   :  { %v530_v54 = vpop.f32.mrf.mxu1 }
 0x197   :  { %v537_v55 = vadd.f32 %v530_v54, %v423_v53  ;;  %v760_v53 = vld [vmem:[%s2180_s6 + $0x78] sm:$0xff]  ;;  %v2441_v54 = vld [vmem:[%s2180_s6 + $0x70] sm:$0xff] }
 0x198   :  { %761 = vmatpush.msra.mxu1 %v760_v53 }
 0x199   :  { %v567_v57 = vmul.f32 %v561_v56, %v537_v55 }
 0x19a   :  { %762 = vmatpush.msra.mxu1 %v2441_v54 }
 0x19b   :  { %596 = vmatmul.f32.gmra.mxu2 %v567_v57 }
 0x1fe   :  { %v585_v58 = vpop.f32.mrf.mxu2 }
 0x206   :  { %v588_v59 = vpop.f32.mrf.mxu2 }
 0x207   :  { %v600_v62 = vadd.f32 %v588_v59, %v585_v58  ;;  %v2444_v58 = vld [vmem:[%s2180_s6 + $0x68] sm:$0xff]  ;;  %v2447_v59 = vld [vmem:[%s2185_s12 + $0x78] sm:$0xff] }
 0x208   :  { %803 = vmatpush.msra.mxu2 %v2447_v59  ;;  %763 = vmatpush.msra.mxu1 %v2444_v58 }
 0x20e   :  { %v591_v60 = vpop.f32.mrf.mxu2 }
 0x20f   :  { %v601_v63 = vadd.f32 %v600_v62, %v591_v60 }
 0x216   :  { %v594_v61 = vpop.f32.mrf.mxu2 }
 0x217   :  { %v602_v0 = vadd.f32 %v601_v63, %v594_v61  ;;  %v2451_v63 = vld [vmem:[%s2185_s12 + $0x70] sm:$0xff] }
 0x218   :  { %804 = vmatpush.msra.mxu2 %v2451_v63 }
 0x21e   :  { %v597_v1 = vpop.f32.mrf.mxu2 }
 0x21f   :  { %v604_v2 = vsel %vm603_vm3, %v597_v1, 0.0 }
 0x220   :  { %v605_v3 = vadd.f32 %v604_v2, %v602_v0 }
 0x222   :  { %v606_v4 = vrot.slane %v605_v3, 4 }
 0x224   :  { %v607_v5 = vadd.f32 %v606_v4, %v605_v3  ;;  %v757_v3 = vld [vmem:[%s2180_s6 + $0x60] sm:$0xff]  ;;  %v2458_v4 = vld [vmem:[%s2185_s12 + $0x68] sm:$0xff] }
 0x225   :  { %764 = vmatpush.msra.mxu1 %v757_v3  ;;  %805 = vmatpush.msra.mxu2 %v2458_v4 }
 0x226   :  { %v608_v6 = vrot.slane %v607_v5, 2 }
 0x228   :  { %v609_v7 = vadd.f32 %v608_v6, %v607_v5 }
 0x22a   :  { %v610_v8 = vrot.slane %v609_v7, 1 }
 0x22c   :  { %v611_v9 = vadd.f32 %v610_v8, %v609_v7  ;;  %v756_v7 = vld [vmem:[%s2180_s6 + $0x58] sm:$0xff]  ;;  %v2465_v8 = vld [vmem:[%s2185_s12 + $0x60] sm:$0xff] }
 0x22d   :  { %765 = vmatpush.msra.mxu1 %v756_v7  ;;  %806 = vmatpush.msra.mxu2 %v2465_v8 }
 0x22e   :  { %v2432_v10 = vsub.f32 %v533_v30, %v611_v9  ;;  %v613_v13 = vsub.f32 %v534_v36, %v611_v9  ;;  %v614_v16 = vsub.f32 %v535_v42, %v611_v9  ;;  %v615_v19 = vsub.f32 %v536_v48, %v611_v9 }
 0x22f   :  { %v616_v22 = vsub.f32 %v537_v55, %v611_v9 }
 0x230   :  { %v617_v11 = vmul.f32 %v2432_v10, %v2432_v10  ;;  %v618_v14 = vmul.f32 %v613_v13, %v613_v13  ;;  %v619_v17 = vmul.f32 %v614_v16, %v614_v16  ;;  %v620_v20 = vmul.f32 %v615_v19, %v615_v19 }
 0x231   :  { %v621_v23 = vmul.f32 %v616_v22, %v616_v22 }
 0x232   :  { %v622_v12 = vmul.f32 %v617_v11, %v541_v28  ;;  %v623_v15 = vmul.f32 %v618_v14, %v546_v37  ;;  %v624_v18 = vmul.f32 %v619_v17, %v551_v40  ;;  %v625_v21 = vmul.f32 %v620_v20, %v556_v49  ;;  %v755_v11 = vld [vmem:[%s2180_s6 + $0x50] sm:$0xff]  ;;  %v754_v14 = vld [vmem:[%s2180_s6 + $0x48] sm:$0xff]  ;;  %v703_v17 = vld [vmem:[%s2742_s0] sm:$0xff] }
 0x233   :  { %v626_v24 = vmul.f32 %v621_v23, %v561_v56  ;;  %766 = vmatpush.msra.mxu1 %v755_v11  ;;  %v796_v20 = vld [vmem:[%s2185_s12 + $0x48] sm:$0xff]  ;;  %v751_v23 = vld [vmem:[%s2180_s6 + $0x30] sm:$0xff] }
 0x234   :  { %643 = vmatmul.f32.vlgmr.msrb.gmra.mxu3 %v622_v12  ;;  %v2470_v12 = vld [vmem:[%s2185_s12 + $0x58] sm:$0xff] }
 0x235   :  { %807 = vmatpush.msra.mxu2 %v2470_v12  ;;  %767 = vmatpush.msra.mxu1 %v754_v14 }
 0x23c   :  { %646 = vmatmul.f32.gmra.mxu3 %v623_v15  ;;  %v2475_v15 = vld [vmem:[%s2185_s12 + $0x50] sm:$0xff] }
 0x23d   :  { %808 = vmatpush.msra.mxu2 %v2475_v15 }
 0x23f   :  { %809 = vmatpush.msra.mxu2 %v796_v20 }
 0x244   :  { %649 = vmatmul.f32.gmra.mxu3 %v624_v18  ;;  %v832_v18 = vld [vmem:[%s2743_s5] sm:$0xff] }
 0x24c   :  { %652 = vmatmul.f32.gmra.mxu3 %v625_v21  ;;  %v752_v21 = vld [vmem:[%s2180_s6 + $0x38] sm:$0xff] }
 0x254   :  { %655 = vmatmul.f32.gmra.mxu3 %v626_v24  ;;  %v794_v24 = vld [vmem:[%s2185_s12 + $0x38] sm:$0xff] }
 0x2b7   :  { %v644_v25 = vpop.f32.mrf.mxu3 }
 0x2bf   :  { %v647_v26 = vpop.f32.mrf.mxu3 }
 0x2c0   :  { %v659_v29 = vadd.f32 %v647_v26, %v644_v25  ;;  %v750_v25 = vld [vmem:[%s2180_s6 + $0x28] sm:$0xff] }
 0x2c1   :  { %v704_v26 = vld [vmem:[%s2742_s0 + $0x8] sm:$0xff] }
 0x2c7   :  { %v650_v27 = vpop.f32.mrf.mxu3 }
 0x2c8   :  { %v660_v30 = vadd.f32 %v659_v29, %v650_v27  ;;  %v833_v27 = vld [vmem:[%s2743_s5 + $0x8] sm:$0xff]  ;;  %v793_v29 = vld [vmem:[%s2185_s12 + $0x30] sm:$0xff] }
 0x2cf   :  { %v653_v28 = vpop.f32.mrf.mxu3 }
 0x2d0   :  { %v661_v31 = vadd.f32 %v660_v30, %v653_v28  ;;  %v749_v28 = vld [vmem:[%s2180_s6 + $0x20] sm:$0xff]  ;;  %v748_v30 = vld [vmem:[%s2180_s6 + $0x18] sm:$0xff] }
 0x2d7   :  { %v656_v32 = vpop.f32.mrf.mxu3 }
 0x2d8   :  { %v662_v33 = vsel %vm603_vm3, %v656_v32, 0.0  ;;  %v747_v32 = vld [vmem:[%s2180_s6 + $0x10] sm:$0xff] }
 0x2d9   :  { %v663_v34 = vadd.f32 %v662_v33, %v661_v31  ;;  %v792_v31 = vld [vmem:[%s2185_s12 + $0x28] sm:$0xff]  ;;  %v791_v33 = vld [vmem:[%s2185_s12 + $0x20] sm:$0xff] }
 0x2db   :  { %v664_v35 = vrot.slane %v663_v34, 4 }
 0x2dd   :  { %v665_v36 = vadd.f32 %v664_v35, %v663_v34  ;;  %v746_v34 = vld [vmem:[%s2180_s6 + $0x8] sm:$0xff]  ;;  %v705_v35 = vld [vmem:[%s2742_s0 + $0x10] sm:$0x3f]  ;;  %s1834_s0 = sshll.u32 %s2325_s30, 4  ;;  %s1835_s0 = int_to_ptr.hbm [resolvable:$true] %s1834_s0 }
 0x2df   :  { %v666_v37 = vrot.slane %v665_v36, 2 }
 0x2e1   :  { %v667_v38 = vadd.f32 %v666_v37, %v665_v36  ;;  %v834_v36 = vld [vmem:[%s2743_s5 + $0x10] sm:$0x3f]  ;;  %v745_v37 = vld [vmem:[%s2180_s6] sm:$0xff]  ;;  %s2049_s5 = sshra.s32 %s1835_s0, 4  ;;  %s2050_s5 = int_to_ptr.hbm [resolvable:$true] %s2049_s5 }
 0x2e2   :  { %p2054_p1 = scmp.lt.s32.totalorder %s2050_s5, %s2325_s30 }
 0x2e3   :  { %v668_v39 = vrot.slane %v667_v38, 1 }
 0x2e5   :  { %v669_v40 = vadd.f32 %v668_v39, %v667_v38  ;;  %v790_v38 = vld [vmem:[%s2185_s12 + $0x18] sm:$0xff]  ;;  %v789_v39 = vld [vmem:[%s2185_s12 + $0x10] sm:$0xff] }
 0x2e7   :  { %v670_v41 = vadd.f32 1e-05, %v669_v40  ;;  %v788_v40 = vld [vmem:[%s2185_s12 + $0x8] sm:$0xff] }
 0x2e9   :  { %2033 = vrsqrt.f32 %v670_v41  ;;  %vm677_vm5 = vweird.f32 %v670_v41 }
 0x2ef   :  { %v2034_v42 = vpop.eup %2033 }
 0x2f0   :  { %v672_v43 = vmul.f32 %v2034_v42, %v670_v41  ;;  %vm678_vm4 = vweird.f32 %v2034_v42  ;;  %v787_v41 = vld [vmem:[%s2185_s12] sm:$0xff] }
 0x2f1   :  { %vm679_vm6 = vmor %vm677_vm5, %vm678_vm4 }
 0x2f2   :  { %v673_v44 = vmul.f32 %v2034_v42, %v672_v43 }
 0x2f4   :  { %v674_v45 = vmul.f32 0.5, %v673_v44 }
 0x2f6   :  { %v675_v46 = vsub.f32 1.5, %v674_v45 }
 0x2f8   :  { %v676_v48 = vmul.f32 %v2034_v42, %v675_v46 }
 0x2fa   :  { %v680_v49 = vsel %vm679_vm6, %v2034_v42, %v676_v48 }
 0x2fb   :  { %v681_v50 = vmul.f32 %v680_v49, %v201_v47 }
 0x2fd   :  { %v683_v51 = vperm.slane %v681_v50, 0 }
 0x2ff   :  { %v689_v55 = vmul.f32 %v683_v51, %v616_v22  ;;  %v688_v56 = vmul.f32 %v683_v51, %v615_v19  ;;  %v687_v57 = vmul.f32 %v683_v51, %v614_v16  ;;  %v686_v62 = vmul.f32 %v683_v51, %v613_v13  ;;  %v753_v19 = vld [vmem:[%s2180_s6 + $0x40] sm:$0xff]  ;;  %s2754_s6 = sld [smem:[#allocation16_spill]] }
 0x300   :  { %v685_v2 = vmul.f32 %v683_v51, %v2432_v10  ;;  %768 = vmatpush.msra.mxu1 %v753_v19  ;;  %v795_v22 = vld [vmem:[%s2185_s12 + $0x40] sm:$0xff]  ;;  %s2755_s12 = sld [smem:[#allocation19_spill]] }
 0x301   :  { %v697_v60 = vadd.f32 %v2028_v52, %v689_v55  ;;  %v696_v61 = vadd.f32 %v2028_v52, %v688_v56  ;;  %v695_v1 = vadd.f32 %v2028_v52, %v687_v57  ;;  %v694_v6 = vadd.f32 %v2028_v52, %v686_v62  ;;  %810 = vmatpush.msra.mxu2 %v795_v22 }
 0x302   :  { %v693_v10 = vadd.f32 %v2028_v52, %v685_v2  ;;  %769 = vmatpush.msra.mxu1 %v752_v21 }
 0x303   :  { %v702_v0 = vmax.f32 %v697_v60, 0.0  ;;  %v701_v5 = vmax.f32 %v696_v61, 0.0  ;;  %v700_v9 = vmax.f32 %v695_v1, 0.0  ;;  %v699_v13 = vmax.f32 %v694_v6, 0.0  ;;  %811 = vmatpush.msra.mxu2 %v794_v24  ;;  %v993_v6 = vld [vmem:[%s2745_s13] sm:$0xff] }
 0x304   :  { %v698_v16 = vmax.f32 %v693_v10, 0.0  ;;  %770 = vmatpush.msra.mxu1 %v751_v23  ;;  %v992_v10 = vld [vmem:[%s2747_s21 + $0x48] sm:$0xff] }
 0x305   :  { %1918 = vmatpush.msk.msra.mxu0 %vm603_vm3, %v702_v0  ;;  %1922 = vmatpush.msk.msra.mxu3 %vm603_vm3, %v702_v0 }
 0x306   :  { %771 = vmatpush.msra.mxu1 %v750_v25  ;;  %812 = vmatpush.msra.mxu2 %v793_v29 }
 0x307   :  { %731 = vmatpush.msra.mxu0 %v701_v5  ;;  %856 = vmatpush.msra.mxu3 %v701_v5  ;;  %v941_v5 = vld [vmem:[%s2744_s9] sm:$0xff] }
 0x308   :  { %772 = vmatpush.msra.mxu1 %v749_v28  ;;  %813 = vmatpush.msra.mxu2 %v792_v31 }
 0x309   :  { %732 = vmatpush.msra.mxu0 %v700_v9  ;;  %857 = vmatpush.msra.mxu3 %v700_v9  ;;  %v1040_v9 = vld [vmem:[%s2746_s17 + $0x48] sm:$0xff] }
 0x30a   :  { %773 = vmatpush.msra.mxu1 %v748_v30  ;;  %814 = vmatpush.msra.mxu2 %v791_v33 }
 0x30b   :  { %733 = vmatpush.msra.mxu0 %v699_v13  ;;  %858 = vmatpush.msra.mxu3 %v699_v13  ;;  %v1038_v13 = vld [vmem:[%s2746_s17 + $0x38] sm:$0xff] }
 0x30c   :  { %774 = vmatpush.msra.mxu1 %v747_v32  ;;  %815 = vmatpush.msra.mxu2 %v790_v38 }
 0x30d   :  { %734 = vmatpush.msra.mxu0 %v698_v16  ;;  %859 = vmatpush.msra.mxu3 %v698_v16  ;;  %v995_v16 = vld [vmem:[%s2745_s13 + $0x10] sm:$0xf] }
 0x30e   :  { %1919 = vmatmul.msk.f32.vlgmr.msra.gmra.mxu0 %vm706_vm7, %v703_v17  ;;  %1923 = vmatmul.msk.f32.vlgmr.msra.gmra.mxu3 %vm706_vm7, %v832_v18  ;;  %v1112_v17 = vld [vmem:[%s2748_s25] sm:$0xff]  ;;  %v1113_v18 = vld [vmem:[%s2748_s25 + $0x8] sm:$0xff] }
 0x30f   :  { %870 = vmatpush.msrb.mxu0 %v760_v53  ;;  %775 = vmatpush.msra.mxu1 %v746_v34 }
 0x310   :  { %816 = vmatpush.msra.mxu2 %v789_v39 }
 0x311   :  { %871 = vmatpush.msrb.mxu0 %v2441_v54  ;;  %776 = vmatpush.msra.mxu1 %v745_v37 }
 0x312   :  { %817 = vmatpush.msra.mxu2 %v788_v40 }
 0x313   :  { %872 = vmatpush.msrb.mxu0 %v2444_v58  ;;  %899 = vmatpush.msrb.mxu1 %v2447_v59 }
 0x314   :  { %818 = vmatpush.msra.mxu2 %v787_v41 }
 0x315   :  { %873 = vmatpush.msrb.mxu0 %v757_v3  ;;  %900 = vmatpush.msrb.mxu1 %v2451_v63 }
 0x316   :  { %1920 = vmatmul.msk.f32.gmra.mxu0 %vm706_vm7, %v704_v26  ;;  %1924 = vmatmul.msk.f32.gmra.mxu3 %vm706_vm7, %v833_v27  ;;  %v1034_v26 = vld [vmem:[%s2746_s17 + $0x18] sm:$0xff] }
 0x317   :  { %874 = vmatpush.msrb.mxu0 %v756_v7  ;;  %901 = vmatpush.msrb.mxu1 %v2458_v4  ;;  %v942_v7 = vld [vmem:[%s2744_s9 + $0x8] sm:$0xff]  ;;  %v986_v27 = vld [vmem:[%s2747_s21 + $0x18] sm:$0xff] }
 0x319   :  { %875 = vmatpush.msrb.mxu0 %v755_v11  ;;  %902 = vmatpush.msrb.mxu1 %v2465_v8  ;;  %v994_v8 = vld [vmem:[%s2745_s13 + $0x8] sm:$0xff]  ;;  %v1039_v11 = vld [vmem:[%s2746_s17 + $0x40] sm:$0xff] }
 0x31b   :  { %876 = vmatpush.msrb.mxu0 %v754_v14  ;;  %903 = vmatpush.msrb.mxu1 %v2470_v12  ;;  %v991_v12 = vld [vmem:[%s2747_s21 + $0x40] sm:$0xff]  ;;  %v990_v14 = vld [vmem:[%s2747_s21 + $0x38] sm:$0xff] }
 0x31d   :  { %877 = vmatpush.msrb.mxu0 %v753_v19  ;;  %904 = vmatpush.msrb.mxu1 %v2475_v15  ;;  %v943_v15 = vld [vmem:[%s2744_s9 + $0x10] sm:$0xf] }
 0x31e   :  { %1921 = vmatmul.msk.f32.gmra.mxu0 %vm706_vm7, %v705_v35  ;;  %1925 = vmatmul.msk.f32.gmra.mxu3 %vm706_vm7, %v834_v36  ;;  %v1114_v19 = vld [vmem:[%s2748_s25 + $0x10] sm:$0xf]  ;;  %v1158_v35 = vld [vmem:[%s2749_s29 + $0x40] sm:$0xff]  ;;  %v1157_v36 = vld [vmem:[%s2749_s29 + $0x38] sm:$0xff] }
 0x31f   :  { %878 = vmatpush.msrb.mxu0 %v752_v21  ;;  %905 = vmatpush.msrb.mxu1 %v796_v20  ;;  %v1037_v20 = vld [vmem:[%s2746_s17 + $0x30] sm:$0xff] }
 0x320   :  { %v989_v21 = vld [vmem:[%s2747_s21 + $0x30] sm:$0xff] }
 0x321   :  { %879 = vmatpush.msrb.mxu0 %v751_v23  ;;  %906 = vmatpush.msrb.mxu1 %v795_v22  ;;  %v1036_v22 = vld [vmem:[%s2746_s17 + $0x28] sm:$0xff] }
 0x322   :  { %v988_v23 = vld [vmem:[%s2747_s21 + $0x28] sm:$0xff] }
 0x323   :  { %880 = vmatpush.msrb.mxu0 %v750_v25  ;;  %907 = vmatpush.msrb.mxu1 %v794_v24  ;;  %v1035_v24 = vld [vmem:[%s2746_s17 + $0x20] sm:$0xff] }
 0x324   :  { %v987_v25 = vld [vmem:[%s2747_s21 + $0x20] sm:$0xff] }
 0x325   :  { %881 = vmatpush.msrb.mxu0 %v749_v28  ;;  %908 = vmatpush.msrb.mxu1 %v793_v29  ;;  %v1033_v28 = vld [vmem:[%s2746_s17 + $0x10] sm:$0xff] }
 0x326   :  { %v985_v29 = vld [vmem:[%s2747_s21 + $0x10] sm:$0xff] }
 0x327   :  { %882 = vmatpush.msrb.mxu0 %v748_v30  ;;  %909 = vmatpush.msrb.mxu1 %v792_v31  ;;  %v1032_v30 = vld [vmem:[%s2746_s17 + $0x8] sm:$0xff] }
 0x328   :  { %v984_v31 = vld [vmem:[%s2747_s21 + $0x8] sm:$0xff] }
 0x329   :  { %883 = vmatpush.msrb.mxu0 %v747_v32  ;;  %910 = vmatpush.msrb.mxu1 %v791_v33  ;;  %v1159_v32 = vld [vmem:[%s2749_s29 + $0x48] sm:$0xff]  ;;  %v1031_v33 = vld [vmem:[%s2746_s17] sm:$0xff] }
 0x32b   :  { %884 = vmatpush.msrb.mxu0 %v746_v34  ;;  %911 = vmatpush.msrb.mxu1 %v790_v38  ;;  %v983_v34 = vld [vmem:[%s2747_s21] sm:$0xff]  ;;  %v1155_v38 = vld [vmem:[%s2749_s29 + $0x28] sm:$0xff] }
 0x32d   :  { %885 = vmatpush.msrb.mxu0 %v745_v37  ;;  %912 = vmatpush.msrb.mxu1 %v789_v39  ;;  %v1156_v37 = vld [vmem:[%s2749_s29 + $0x30] sm:$0xff]  ;;  %v1154_v39 = vld [vmem:[%s2749_s29 + $0x20] sm:$0xff] }
 0x32f   :  { %913 = vmatpush.msrb.mxu1 %v788_v40  ;;  %1057 = vmatpush.msra.mxu0 %v1040_v9  ;;  %v1153_v40 = vld [vmem:[%s2749_s29 + $0x18] sm:$0xff]  ;;  %v1206_v9 = vpop.permute.xlu0 %1205 }
 0x331   :  { %914 = vmatpush.msrb.mxu1 %v787_v41  ;;  %1058 = vmatpush.msra.mxu0 %v1039_v11  ;;  %v1152_v41 = vld [vmem:[%s2749_s29 + $0x10] sm:$0xff] }
 0x333   :  { %1059 = vmatpush.msra.mxu0 %v1038_v13 }
 0x335   :  { %1060 = vmatpush.msra.mxu0 %v1037_v20 }
 0x337   :  { %1061 = vmatpush.msra.mxu0 %v1036_v22 }
 0x339   :  { %1062 = vmatpush.msra.mxu0 %v1035_v24 }
 0x33b   :  { %1063 = vmatpush.msra.mxu0 %v1034_v26 }
 0x33d   :  { %1064 = vmatpush.msra.mxu0 %v1033_v28 }
 0x33f   :  { %1065 = vmatpush.msra.mxu0 %v1032_v30 }
 0x341   :  { %1066 = vmatpush.msra.mxu0 %v1031_v33 }
 0x38b   :  { %v736_v42 = vpop.f32.mrf.mxu0 }
 0x38c   :  { %777 = vmatmul.f32.vlgmr.msra.gmra.mxu1 %v736_v42  ;;  %819 = vmatmul.f32.vlgmr.msra.gmra.mxu2 %v736_v42  ;;  %v1151_v42 = vld [vmem:[%s2749_s29 + $0x8] sm:$0xff] }
 0x38d   :  { %1092 = vmatpush.msra.mxu1 %v992_v10 }
 0x38f   :  { %1093 = vmatpush.msra.mxu1 %v991_v12 }
 0x391   :  { %v861_v43 = vpop.f32.mrf.mxu3  ;;  %1094 = vmatpush.msra.mxu1 %v990_v14 }
 0x392   :  { %886 = vmatmul.f32.vlgmr.msrb.gmra.mxu0 %v861_v43 }
 0x393   :  { %v739_v44 = vpop.f32.mrf.mxu0  ;;  %1095 = vmatpush.msra.mxu1 %v989_v21 }
 0x394   :  { %780 = vmatmul.f32.gmra.mxu1 %v739_v44  ;;  %822 = vmatmul.f32.gmra.mxu2 %v739_v44 }
 0x395   :  { %1096 = vmatpush.msra.mxu1 %v988_v23 }
 0x397   :  { %1097 = vmatpush.msra.mxu1 %v987_v25 }
 0x399   :  { %v864_v45 = vpop.f32.mrf.mxu3  ;;  %1098 = vmatpush.msra.mxu1 %v986_v27 }
 0x39a   :  { %889 = vmatmul.f32.gmra.mxu0 %v864_v45 }
 0x39b   :  { %v742_v46 = vpop.f32.mrf.mxu0  ;;  %1099 = vmatpush.msra.mxu1 %v985_v29 }
 0x39c   :  { %783 = vmatmul.f32.gmra.mxu1 %v742_v46  ;;  %825 = vmatmul.f32.gmra.mxu2 %v742_v46 }
 0x39d   :  { %1100 = vmatpush.msra.mxu1 %v984_v31 }
 0x39f   :  { %1101 = vmatpush.msra.mxu1 %v983_v34 }
 0x3a1   :  { %v867_v47 = vpop.f32.mrf.mxu3 }
 0x3a2   :  { %892 = vmatmul.f32.gmra.mxu0 %v867_v47 }
 0x3a4   :  { %915 = vmatmul.f32.vlgmr.msrb.gmra.mxu1 %v861_v43  ;;  %v1150_v43 = vld [vmem:[%s2749_s29] sm:$0xff] }
 0x3ac   :  { %918 = vmatmul.f32.gmra.mxu1 %v864_v45 }
 0x3b4   :  { %921 = vmatmul.f32.gmra.mxu1 %v867_v47 }
 0x409   :  { %v778_v48 = vpop.f32.mrf.mxu1 }
 0x40f   :  { %v820_v50 = vpop.f32.mrf.mxu2  ;;  %v887_v51 = vpop.f32.mrf.mxu0 }
 0x410   :  { %v829_v61 = vmax.f32 %v778_v48, %v820_v50 }
 0x411   :  { %v781_v49 = vpop.f32.mrf.mxu1 }
 0x412   :  { %v896_v2 = vmax.f32 %v829_v61, %v887_v51 }
 0x417   :  { %v823_v53 = vpop.f32.mrf.mxu2  ;;  %v890_v55 = vpop.f32.mrf.mxu0 }
 0x418   :  { %v830_v60 = vmax.f32 %v781_v49, %v823_v53  ;;  %v938_v53 = vld [vmem:[%s2750_s3 + $0x38] sm:$0xff] }
 0x419   :  { %v784_v52 = vpop.f32.mrf.mxu1  ;;  %1234 = vmatpush.msrb.mxu0 %v938_v53  ;;  %1290 = vmatpush.msrb.mxu1 %v938_v53  ;;  %v1385_v53 = vld [vmem:[%s2751_s8 + $0x20] sm:$0xff] }
 0x41a   :  { %v897_v0 = vmax.f32 %v830_v60, %v890_v55  ;;  %v936_v55 = vld [vmem:[%s2750_s3 + $0x28] sm:$0xff]  ;;  %v931_v60 = vld [vmem:[%s2750_s3] sm:$0xff] }
 0x41f   :  { %v826_v56 = vpop.f32.mrf.mxu2  ;;  %v893_v59 = vpop.f32.mrf.mxu0 }
 0x420   :  { %v831_v58 = vmax.f32 %v784_v52, %v826_v56  ;;  %v935_v56 = vld [vmem:[%s2750_s3 + $0x20] sm:$0xff] }
 0x421   :  { %v916_v54 = vpop.f32.mrf.mxu1 }
 0x422   :  { %v898_v62 = vmax.f32 %v831_v58, %v893_v59  ;;  %v925_v4 = vmax.f32 %v896_v2, %v916_v54  ;;  %v937_v54 = vld [vmem:[%s2750_s3 + $0x30] sm:$0xff]  ;;  %v932_v59 = vld [vmem:[%s2750_s3 + $0x8] sm:$0xff] }
 0x423   :  { %1235 = vmatpush.msrb.mxu0 %v937_v54  ;;  %1291 = vmatpush.msrb.mxu1 %v937_v54  ;;  %v933_v58 = vld [vmem:[%s2750_s3 + $0x10] sm:$0xff] }
 0x425   :  { %1236 = vmatpush.msrb.mxu0 %v936_v55  ;;  %1292 = vmatpush.msrb.mxu1 %v936_v55  ;;  %v1384_v55 = vld [vmem:[%s2751_s8 + $0x18] sm:$0xff] }
 0x427   :  { %1237 = vmatpush.msrb.mxu0 %v935_v56  ;;  %1293 = vmatpush.msrb.mxu1 %v935_v56  ;;  %v1383_v56 = vld [vmem:[%s2751_s8 + $0x10] sm:$0xff] }
 0x429   :  { %v919_v57 = vpop.f32.mrf.mxu1 }
 0x42a   :  { %v926_v3 = vmax.f32 %v897_v0, %v919_v57  ;;  %v934_v57 = vld [vmem:[%s2750_s3 + $0x18] sm:$0xff] }
 0x42b   :  { %1238 = vmatpush.msrb.mxu0 %v934_v57  ;;  %1294 = vmatpush.msrb.mxu1 %v934_v57 }
 0x42d   :  { %1239 = vmatpush.msrb.mxu0 %v933_v58  ;;  %1295 = vmatpush.msrb.mxu1 %v933_v58  ;;  %v1382_v58 = vld [vmem:[%s2751_s8 + $0x8] sm:$0xff] }
 0x42f   :  { %1240 = vmatpush.msrb.mxu0 %v932_v59  ;;  %1296 = vmatpush.msrb.mxu1 %v932_v59 }
 0x431   :  { %v922_v63 = vpop.f32.mrf.mxu1  ;;  %1241 = vmatpush.msrb.mxu0 %v931_v60  ;;  %1297 = vmatpush.msrb.mxu1 %v931_v60  ;;  %v1381_v60 = vld [vmem:[%s2751_s8] sm:$0xff] }
 0x432   :  { %v927_v1 = vmax.f32 %v898_v62, %v922_v63 }
 0x434   :  { %1926 = vmatpush.msk.msrb.mxu2 %vm224_vm0, %v927_v1  ;;  %1930 = vmatpush.msk.msrb.mxu3 %vm224_vm0, %v927_v1 }
 0x436   :  { %971 = vmatpush.msrb.mxu2 %v926_v3  ;;  %1019 = vmatpush.msrb.mxu3 %v926_v3 }
 0x438   :  { %972 = vmatpush.msrb.mxu2 %v925_v4  ;;  %1020 = vmatpush.msrb.mxu3 %v925_v4 }
 0x439   :  { %1927 = vmatmul.msk.f32.vlgmr.msrb.gmra.mxu2 %vm944_vm8, %v941_v5  ;;  %1931 = vmatmul.msk.f32.vlgmr.msrb.gmra.mxu3 %vm944_vm8, %v993_v6 }
 0x43a   :  { %1940 = vmatpush.msk.msra.mxu2 %vm224_vm0, %v927_v1  ;;  %1175 = vmatpush.msra.mxu3 %v1159_v32  ;;  %v1201_v1 = vpop.permute.xlu2 %1200 }
 0x43c   :  { %1138 = vmatpush.msra.mxu2 %v926_v3  ;;  %1176 = vmatpush.msra.mxu3 %v1158_v35 }
 0x43e   :  { %1139 = vmatpush.msra.mxu2 %v925_v4  ;;  %1177 = vmatpush.msra.mxu3 %v1157_v36 }
 0x440   :  { %1178 = vmatpush.msra.mxu3 %v1156_v37 }
 0x441   :  { %1928 = vmatmul.msk.f32.gmra.mxu2 %vm944_vm8, %v942_v7  ;;  %1932 = vmatmul.msk.f32.gmra.mxu3 %vm944_vm8, %v994_v8 }
 0x442   :  { %1179 = vmatpush.msra.mxu3 %v1155_v38 }
 0x444   :  { %1180 = vmatpush.msra.mxu3 %v1154_v39 }
 0x446   :  { %1181 = vmatpush.msra.mxu3 %v1153_v40 }
 0x448   :  { %1182 = vmatpush.msra.mxu3 %v1152_v41 }
 0x449   :  { %1929 = vmatmul.msk.f32.gmra.mxu2 %vm944_vm8, %v943_v15  ;;  %1933 = vmatmul.msk.f32.gmra.mxu3 %vm944_vm8, %v995_v16  ;;  %v1211_v16 = vpop.permute.xlu1 %1210 }
 0x44a   :  { %1183 = vmatpush.msra.mxu3 %v1151_v42 }
 0x44c   :  { %1184 = vmatpush.msra.mxu3 %v1150_v43 }
 0x451   :  { %1941 = vmatmul.msk.f32.vlgmr.msra.gmra.mxu2 %vm944_vm8, %v1112_v17 }
 0x459   :  { %1942 = vmatmul.msk.f32.gmra.mxu2 %vm944_vm8, %v1113_v18 }
 0x461   :  { %1943 = vmatmul.msk.f32.gmra.mxu2 %vm944_vm8, %v1114_v19 }
 0x4bc   :  { %v974_v44 = vpop.f32.mrf.mxu2  ;;  %v1022_v45 = vpop.f32.mrf.mxu3 }
 0x4bd   :  { %1934 = vmatmul.msk.f32.vlgmr.msra.gmra.mxu0 %vm1041_vm9, %v1022_v45  ;;  %1937 = vmatmul.msk.f32.vlgmr.msra.gmra.mxu1 %vm1041_vm9, %v974_v44  ;;  %v1388_v45 = vld [vmem:[%s2751_s8 + $0x38] sm:$0xff] }
 0x4be   :  { %1403 = vmatpush.msrb.mxu3 %v1388_v45  ;;  %1496 = vmatpush.msra.mxu0 %v1388_v45 }
 0x4c4   :  { %v977_v46 = vpop.f32.mrf.mxu2  ;;  %v1025_v47 = vpop.f32.mrf.mxu3 }
 0x4c5   :  { %1935 = vmatmul.msk.f32.gmra.mxu0 %vm1041_vm9, %v1025_v47  ;;  %1938 = vmatmul.msk.f32.gmra.mxu1 %vm1041_vm9, %v977_v46 }
 0x4cc   :  { %v980_v48 = vpop.f32.mrf.mxu2  ;;  %v1028_v49 = vpop.f32.mrf.mxu3 }
 0x4cd   :  { %1936 = vmatmul.msk.f32.gmra.mxu0 %vm1041_vm9, %v1028_v49  ;;  %1939 = vmatmul.msk.f32.gmra.mxu1 %vm1041_vm9, %v980_v48  ;;  %v1387_v49 = vld [vmem:[%s2751_s8 + $0x30] sm:$0xff] }
 0x4ce   :  { %1404 = vmatpush.msrb.mxu3 %v1387_v49  ;;  %1497 = vmatpush.msra.mxu0 %v1387_v49 }
 0x4d4   :  { %v1141_v50 = vpop.f32.mrf.mxu2 }
 0x4d5   :  { %1944 = vmatmul.msk.f32.vlgmr.msra.gmra.mxu3 %vm1041_vm9, %v1141_v50 }
 0x4dc   :  { %v1144_v51 = vpop.f32.mrf.mxu2 }
 0x4dd   :  { %1945 = vmatmul.msk.f32.gmra.mxu3 %vm1041_vm9, %v1144_v51  ;;  %v1386_v51 = vld [vmem:[%s2751_s8 + $0x28] sm:$0xff] }
 0x4de   :  { %1405 = vmatpush.msrb.mxu3 %v1386_v51  ;;  %1498 = vmatpush.msra.mxu0 %v1386_v51 }
 0x4e0   :  { %1406 = vmatpush.msrb.mxu3 %v1385_v53  ;;  %1499 = vmatpush.msra.mxu0 %v1385_v53 }
 0x4e2   :  { %1407 = vmatpush.msrb.mxu3 %v1384_v55  ;;  %1500 = vmatpush.msra.mxu0 %v1384_v55 }
 0x4e4   :  { %v1147_v52 = vpop.f32.mrf.mxu2  ;;  %1408 = vmatpush.msrb.mxu3 %v1383_v56  ;;  %1501 = vmatpush.msra.mxu0 %v1383_v56  ;;  %v1572_v56 = vld [vmem:[%s2758_s16] sm:$0x3] }
 0x4e5   :  { %1946 = vmatmul.msk.f32.gmra.mxu3 %vm1041_vm9, %v1147_v52 }
 0x4e6   :  { %1409 = vmatpush.msrb.mxu3 %v1382_v58  ;;  %1502 = vmatpush.msra.mxu0 %v1382_v58  ;;  %v1649_v58 = vld [vmem:[%s2760_s22] sm:$0x3] }
 0x4e8   :  { %1410 = vmatpush.msrb.mxu3 %v1381_v60  ;;  %1503 = vmatpush.msra.mxu0 %v1381_v60  ;;  %v1543_v60 = vld [vmem:[%s2761_s23 + $0x20] sm:$0xff] }
 0x53a   :  { %v1068_v61 = vpop.f32.mrf.mxu0  ;;  %v1103_v62 = vpop.f32.mrf.mxu1 }
 0x53b   :  { %v1104_v63 = vadd.f32 %v1103_v62, %v1068_v61 }
 0x542   :  { %v1071_v3 = vpop.f32.mrf.mxu0  ;;  %v1106_v4 = vpop.f32.mrf.mxu1 }
 0x543   :  { %v1107_v6 = vadd.f32 %v1106_v4, %v1071_v3 }
 0x54a   :  { %v1074_v11 = vpop.f32.mrf.mxu0  ;;  %v1109_v12 = vpop.f32.mrf.mxu1 }
 0x54b   :  { %v1110_v13 = vadd.f32 %v1109_v12, %v1074_v11 }
 0x558   :  { %v1186_v0 = vpop.f32.mrf.mxu3 }
 0x559   :  { %v1195_v2 = vadd.f32 %v1186_v0, %v1104_v63 }
 0x55b   :  { %v1213_v5 = vmul.f32 %v1201_v1, %v1195_v2 }
 0x55d   :  { %1947 = vmatmul.msk.f32.vlgmr.msrb.gmra.mxu0 %vm1216_vm10, %v1213_v5  ;;  %v939_v5 = vld [vmem:[%s2752_s14] sm:$0x1] }
 0x560   :  { %v1189_v7 = vpop.f32.mrf.mxu3 }
 0x561   :  { %v1196_v8 = vadd.f32 %v1189_v7, %v1107_v6 }
 0x563   :  { %v1214_v10 = vmul.f32 %v1206_v9, %v1196_v8 }
 0x565   :  { %1948 = vmatmul.msk.f32.gmra.mxu0 %vm1216_vm10, %v1214_v10  ;;  %v2029_v10 = vld [vmem:[%s2753_s19] ss:$0 sm:$0xff] }
 0x568   :  { %v1192_v14 = vpop.f32.mrf.mxu3 }
 0x569   :  { %v1197_v15 = vadd.f32 %v1192_v14, %v1110_v13 }
 0x56b   :  { %v1215_v17 = vmul.f32 %v1211_v16, %v1197_v15 }
 0x56d   :  { %1949 = vmatmul.msk.f32.gmra.mxu0 %vm1216_vm10, %v1215_v17 }
 0x5da   :  { %v1243_v18 = vpop.f32.mrf.mxu0 }
 0x5db   :  { %v1252_v21 = vsel %vm1216_vm10, %v1243_v18, 0.0 }
 0x5e2   :  { %v1246_v19 = vpop.f32.mrf.mxu0 }
 0x5e3   :  { %v1253_v20 = vsel %vm1216_vm10, %v1246_v19, 0.0 }
 0x5e4   :  { %v1254_v22 = vadd.f32 %v1253_v20, %v1252_v21  ;;  %v1346_v20 = vld [vmem:[%s2754_s6] sm:$0xff]  ;;  %v1347_v21 = vld [vmem:[%s2754_s6 + $0x8] sm:$0x3f] }
 0x5ea   :  { %v1249_v23 = vpop.f32.mrf.mxu0 }
 0x5eb   :  { %v1256_v24 = vsel %vm1255_vm11, %v1249_v23, 0.0  ;;  %v1424_v23 = vld [vmem:[%s2755_s12 + $0x30] sm:$0xff] }
 0x5ec   :  { %v1257_v25 = vadd.f32 %v1256_v24, %v1254_v22  ;;  %v1425_v22 = vld [vmem:[%s2755_s12 + $0x38] sm:$0xff]  ;;  %v1423_v24 = vld [vmem:[%s2755_s12 + $0x28] sm:$0xff] }
 0x5ed   :  { %1521 = vmatpush.msra.mxu1 %v1425_v22 }
 0x5ee   :  { %v1258_v26 = vrot.slane %v1257_v25, 4 }
 0x5ef   :  { %1522 = vmatpush.msra.mxu1 %v1424_v23 }
 0x5f0   :  { %v1259_v27 = vadd.f32 %v1258_v26, %v1257_v25  ;;  %v1422_v25 = vld [vmem:[%s2755_s12 + $0x20] sm:$0xff]  ;;  %v1421_v26 = vld [vmem:[%s2755_s12 + $0x18] sm:$0xff] }
 0x5f1   :  { %1523 = vmatpush.msra.mxu1 %v1423_v24 }
 0x5f2   :  { %v1260_v28 = vrot.slane %v1259_v27, 2 }
 0x5f3   :  { %1524 = vmatpush.msra.mxu1 %v1422_v25 }
 0x5f4   :  { %v1261_v29 = vadd.f32 %v1260_v28, %v1259_v27  ;;  %v1420_v27 = vld [vmem:[%s2755_s12 + $0x10] sm:$0xff]  ;;  %v1419_v28 = vld [vmem:[%s2755_s12 + $0x8] sm:$0xff] }
 0x5f5   :  { %1525 = vmatpush.msra.mxu1 %v1421_v26 }
 0x5f6   :  { %v1262_v30 = vrot.slane %v1261_v29, 1 }
 0x5f7   :  { %1526 = vmatpush.msra.mxu1 %v1420_v27 }
 0x5f8   :  { %v1263_v31 = vadd.f32 %v1262_v30, %v1261_v29  ;;  %v1418_v29 = vld [vmem:[%s2755_s12] sm:$0xff] }
 0x5f9   :  { %1527 = vmatpush.msra.mxu1 %v1419_v28 }
 0x5fa   :  { %v2592_v32 = vsub.f32 %v1195_v2, %v1263_v31  ;;  %v2596_v35 = vsub.f32 %v1196_v8, %v1263_v31  ;;  %v1266_v38 = vsub.f32 %v1197_v15, %v1263_v31 }
 0x5fb   :  { %1528 = vmatpush.msra.mxu1 %v1418_v29 }
 0x5fc   :  { %v1267_v33 = vmul.f32 %v2592_v32, %v2592_v32  ;;  %v1268_v36 = vmul.f32 %v2596_v35, %v2596_v35  ;;  %v1269_v39 = vmul.f32 %v1266_v38, %v1266_v38 }
 0x5fe   :  { %v1270_v34 = vmul.f32 %v1267_v33, %v1201_v1  ;;  %v1271_v37 = vmul.f32 %v1268_v36, %v1206_v9  ;;  %v1272_v40 = vmul.f32 %v1269_v39, %v1211_v16  ;;  %v1452_v33 = vld [vmem:[%s2756_s4 + $0x8] sm:$0x3f]  ;;  %v1577_v39 = vld [vmem:[%s2757_s15 + $0x20] sm:$0xff] }
 0x600   :  { %1950 = vmatmul.msk.f32.vlgmr.msrb.gmra.mxu1 %vm1216_vm10, %v1270_v34 }
 0x608   :  { %1951 = vmatmul.msk.f32.gmra.mxu1 %vm1216_vm10, %v1271_v37 }
 0x610   :  { %1952 = vmatmul.msk.f32.gmra.mxu1 %vm1216_vm10, %v1272_v40  ;;  %v1576_v40 = vld [vmem:[%s2757_s15 + $0x18] sm:$0xff] }
 0x67d   :  { %v1299_v41 = vpop.f32.mrf.mxu1 }
 0x67e   :  { %v1308_v44 = vsel %vm1216_vm10, %v1299_v41, 0.0  ;;  %v1575_v41 = vld [vmem:[%s2757_s15 + $0x10] sm:$0xff] }
 0x685   :  { %v1302_v42 = vpop.f32.mrf.mxu1 }
 0x686   :  { %v1309_v43 = vsel %vm1216_vm10, %v1302_v42, 0.0  ;;  %v1574_v42 = vld [vmem:[%s2757_s15 + $0x8] sm:$0xff] }
 0x687   :  { %v1310_v46 = vadd.f32 %v1309_v43, %v1308_v44  ;;  %v1573_v43 = vld [vmem:[%s2757_s15] sm:$0xff] }
 0x68d   :  { %v1305_v47 = vpop.f32.mrf.mxu1 }
 0x68e   :  { %v1311_v48 = vsel %vm1255_vm11, %v1305_v47, 0.0 }
 0x68f   :  { %v1312_v50 = vadd.f32 %v1311_v48, %v1310_v46 }
 0x691   :  { %v1313_v52 = vrot.slane %v1312_v50, 4 }
 0x693   :  { %v1314_v54 = vadd.f32 %v1313_v52, %v1312_v50 }
 0x695   :  { %v1315_v57 = vrot.slane %v1314_v54, 2 }
 0x697   :  { %v1316_v59 = vadd.f32 %v1315_v57, %v1314_v54  ;;  %v1538_v57 = vld [vmem:[%s2759_s18] sm:$0x3] }
 0x699   :  { %v1317_v61 = vrot.slane %v1316_v59, 1 }
 0x69b   :  { %v1318_v62 = vadd.f32 %v1317_v61, %v1316_v59  ;;  %v1544_v59 = vld [vmem:[%s2761_s23 + $0x28] sm:$0xff]  ;;  %v1542_v61 = vld [vmem:[%s2761_s23 + $0x18] sm:$0xff] }
 0x69c   :  { %1639 = vmatpush.msrb.mxu1 %v1544_v59 }
 0x69d   :  { %v1319_v63 = vadd.f32 1e-05, %v1318_v62  ;;  %v1541_v62 = vld [vmem:[%s2761_s23 + $0x10] sm:$0xff] }
 0x69e   :  { %1640 = vmatpush.msrb.mxu1 %v1543_v60 }
 0x69f   :  { %2035 = vrsqrt.f32 %v1319_v63  ;;  %vm1326_vm13 = vweird.f32 %v1319_v63 }
 0x6a0   :  { %1641 = vmatpush.msrb.mxu1 %v1542_v61 }
 0x6a2   :  { %1642 = vmatpush.msrb.mxu1 %v1541_v62 }
 0x6a5   :  { %v2036_v0 = vpop.eup %2035 }
 0x6a6   :  { %v1321_v1 = vmul.f32 %v2036_v0, %v1319_v63  ;;  %vm1327_vm12 = vweird.f32 %v2036_v0  ;;  %v1655_v63 = vld [vmem:[%s2762_s26 + $0x28] sm:$0xff] }
 0x6a7   :  { %vm1328_vm14 = vmor %vm1326_vm13, %vm1327_vm12 }
 0x6a8   :  { %v1322_v2 = vmul.f32 %v2036_v0, %v1321_v1  ;;  %v1654_v1 = vld [vmem:[%s2762_s26 + $0x20] sm:$0xff] }
 0x6aa   :  { %v1323_v3 = vmul.f32 0.5, %v1322_v2  ;;  %v1539_v2 = vld [vmem:[%s2761_s23] sm:$0xff] }
 0x6ac   :  { %v1324_v4 = vsub.f32 1.5, %v1323_v3  ;;  %v1653_v3 = vld [vmem:[%s2762_s26 + $0x18] sm:$0xff] }
 0x6ae   :  { %v1325_v6 = vmul.f32 %v2036_v0, %v1324_v4  ;;  %v1652_v4 = vld [vmem:[%s2762_s26 + $0x10] sm:$0xff] }
 0x6b0   :  { %v1329_v7 = vsel %vm1328_vm14, %v2036_v0, %v1325_v6  ;;  %v1540_v0 = vld [vmem:[%s2761_s23 + $0x8] sm:$0xff]  ;;  %v1650_v6 = vld [vmem:[%s2762_s26] sm:$0xff] }
 0x6b1   :  { %v1330_v8 = vmul.f32 %v1329_v7, %v939_v5  ;;  %1643 = vmatpush.msrb.mxu1 %v1540_v0  ;;  %v1651_v5 = vld [vmem:[%s2762_s26 + $0x8] sm:$0xff] }
 0x6b2   :  { %v1709_v7 = vld [vmem:[%s2763_s28 + $0x28] sm:$0xff] }
 0x6b3   :  { %v1332_v9 = vperm.slane %v1330_v8, 0  ;;  %1644 = vmatpush.msrb.mxu1 %v1539_v2 }
 0x6b5   :  { %v1336_v11 = vmul.f32 %v1332_v9, %v1266_v38  ;;  %v1335_v12 = vmul.f32 %v1332_v9, %v2596_v35  ;;  %v1334_v13 = vmul.f32 %v1332_v9, %v2592_v32  ;;  %v1451_v32 = vld [vmem:[%s2756_s4] sm:$0xff]  ;;  %v1578_v38 = vld [vmem:[%s2757_s15 + $0x28] sm:$0xff] }
 0x6b6   :  { %1616 = vmatpush.msrb.mxu0 %v1578_v38  ;;  %v2032_v38 = vld [vmem:[%s2320_s24] ss:$0 sm:$0xff] }
 0x6b7   :  { %v1342_v14 = vadd.f32 %v2029_v10, %v1336_v11  ;;  %v1341_v15 = vadd.f32 %v2029_v10, %v1335_v12  ;;  %v1340_v17 = vadd.f32 %v2029_v10, %v1334_v13  ;;  %v1703_v10 = vld [vmem:[%s2764_s1] sm:$0x3]  ;;  %v1707_v13 = vld [vmem:[%s2763_s28 + $0x18] sm:$0xff] }
 0x6b8   :  { %1617 = vmatpush.msrb.mxu0 %v1577_v39  ;;  %v1708_v12 = vld [vmem:[%s2763_s28 + $0x20] sm:$0xff] }
 0x6b9   :  { %v1345_v16 = vmax.f32 %v1342_v14, 0.0  ;;  %v1344_v18 = vmax.f32 %v1341_v15, 0.0  ;;  %v1343_v19 = vmax.f32 %v1340_v17, 0.0  ;;  %v1706_v14 = vld [vmem:[%s2763_s28 + $0x10] sm:$0xff]  ;;  %v1705_v15 = vld [vmem:[%s2763_s28 + $0x8] sm:$0xff]  ;;  %v1761_v17 = vld [vmem:[%s2765_s2 + $0x18] sm:$0xff] }
 0x6ba   :  { %1618 = vmatpush.msrb.mxu0 %v1576_v40 }
 0x6bb   :  { %1953 = vmatpush.msk.msrb.mxu2 %vm603_vm3, %v1345_v16  ;;  %1960 = vmatpush.msk.msra.mxu3 %vm603_vm3, %v1345_v16  ;;  %v1704_v16 = vld [vmem:[%s2763_s28] sm:$0xff]  ;;  %vm1825_vm3 = vcmask 74752  }
 0x6bc   :  { %1619 = vmatpush.msrb.mxu0 %v1575_v41 }
 0x6bd   :  { %1372 = vmatpush.msrb.mxu2 %v1344_v18  ;;  %1473 = vmatpush.msra.mxu3 %v1344_v18 }
 0x6be   :  { %1620 = vmatpush.msrb.mxu0 %v1574_v42 }
 0x6bf   :  { %1373 = vmatpush.msrb.mxu2 %v1343_v19  ;;  %1474 = vmatpush.msra.mxu3 %v1343_v19 }
 0x6c0   :  { %1954 = vmatmul.msk.f32.vlgmr.msrb.gmra.mxu2 %vm1348_vm15, %v1346_v20  ;;  %1621 = vmatpush.msrb.mxu0 %v1573_v43  ;;  %v1760_v20 = vld [vmem:[%s2765_s2 + $0x10] sm:$0xff] }
 0x6c1   :  { %1434 = vmatpush.msra.mxu2 %v1425_v22  ;;  %v1758_v22 = vld [vmem:[%s2765_s2] sm:$0xff] }
 0x6c3   :  { %1435 = vmatpush.msra.mxu2 %v1424_v23  ;;  %v1766_v23 = vld [vmem:[%s2315_s27 + $0x18] sm:$0xff] }
 0x6c5   :  { %1436 = vmatpush.msra.mxu2 %v1423_v24  ;;  %v1765_v24 = vld [vmem:[%s2315_s27 + $0x10] sm:$0xff] }
 0x6c7   :  { %1437 = vmatpush.msra.mxu2 %v1422_v25 }
 0x6c8   :  { %1955 = vmatmul.msk.f32.gmra.mxu2 %vm1348_vm15, %v1347_v21  ;;  %v1759_v21 = vld [vmem:[%s2765_s2 + $0x8] sm:$0xff] }
 0x6c9   :  { %1438 = vmatpush.msra.mxu2 %v1421_v26 }
 0x6cb   :  { %1439 = vmatpush.msra.mxu2 %v1420_v27 }
 0x6cd   :  { %1440 = vmatpush.msra.mxu2 %v1419_v28 }
 0x6cf   :  { %1441 = vmatpush.msra.mxu2 %v1418_v29  ;;  %v2030_v29 = vld [vmem:[%s2766_s7] ss:$0 sm:$0xff] }
 0x743   :  { %v1375_v30 = vpop.f32.mrf.mxu2 }
 0x744   :  { %1956 = vmatmul.msk.f32.vlgmr.msrb.gmra.mxu3 %vm1216_vm10, %v1375_v30  ;;  %1958 = vmatmul.msk.f32.vlgmr.msra.gmra.mxu2 %vm1216_vm10, %v1375_v30 }
 0x74b   :  { %v1378_v31 = vpop.f32.mrf.mxu2 }
 0x74c   :  { %1957 = vmatmul.msk.f32.gmra.mxu3 %vm1216_vm10, %v1378_v31  ;;  %1959 = vmatmul.msk.f32.gmra.mxu2 %vm1216_vm10, %v1378_v31 }
 0x754   :  { %1961 = vmatmul.msk.f32.vlgmr.msra.gmra.mxu3 %vm1348_vm15, %v1451_v32 }
 0x75c   :  { %1962 = vmatmul.msk.f32.gmra.mxu3 %vm1348_vm15, %v1452_v33  ;;  %v1764_v33 = vld [vmem:[%s2315_s27 + $0x8] sm:$0xff] }
 0x7c7   :  { %v1412_v34 = vpop.f32.mrf.mxu3  ;;  %v1443_v44 = vpop.f32.mrf.mxu2 }
 0x7c8   :  { %v1449_v48 = vmax.f32 %v1412_v34, %v1443_v44  ;;  %v1763_v34 = vld [vmem:[%s2315_s27] sm:$0xff]  ;;  %s2051_s27 = scalar_lea.hbm %s2050_s5, 2 }
 0x7c9   :  { %p2052_p0 = scmp.ne.s32.totalorder %s2050_s5, %s2051_s27 }
 0x7cf   :  { %v1415_v35 = vpop.f32.mrf.mxu3  ;;  %v1446_v47 = vpop.f32.mrf.mxu2 }
 0x7d0   :  { %v1450_v49 = vmax.f32 %v1415_v35, %v1446_v47  ;;  %v2031_v35 = vld [vmem:[%s2310_s20] ss:$0 sm:$0xff]  ;;  %s2053_s20 = scalar_lea.hbm %s2325_s30, 2 }
 0x7d1   :  { %p2055_p2 = scmp.lt.s32.totalorder %s2053_s20, %s2051_s27 }
 0x7d3   :  { %p2056_p3 = por %p2055_p2, %p2054_p1 }
 0x7d5   :  { %p2057_p4 = pnand %p2056_p3, %p2052_p0 }
 0x7d7   :  { %v1476_v36 = vpop.f32.mrf.mxu3 }
 0x7d8   :  { %1963 = vmatmul.msk.f32.vlgmr.msra.gmra.mxu0 %vm1216_vm10, %v1476_v36  ;;  %1965 = vmatmul.msk.f32.vlgmr.msra.gmra.mxu1 %vm1216_vm10, %v1476_v36 }
 0x7d9   :  { %1746 = vmatpush.msra.mxu1 %v1709_v7 }
 0x7db   :  { %1747 = vmatpush.msra.mxu1 %v1708_v12 }
 0x7dd   :  { %1748 = vmatpush.msra.mxu1 %v1707_v13 }
 0x7df   :  { %v1479_v37 = vpop.f32.mrf.mxu3  ;;  %1749 = vmatpush.msra.mxu1 %v1706_v14 }
 0x7e0   :  { %1964 = vmatmul.msk.f32.gmra.mxu0 %vm1216_vm10, %v1479_v37  ;;  %1966 = vmatmul.msk.f32.gmra.mxu1 %vm1216_vm10, %v1479_v37 }
 0x7e1   :  { %1750 = vmatpush.msra.mxu1 %v1705_v15 }
 0x7e3   :  { %1751 = vmatpush.msra.mxu1 %v1704_v16 }
 0x855   :  { %v1505_v45 = vpop.f32.mrf.mxu0  ;;  %v1530_v46 = vpop.f32.mrf.mxu1 }
 0x856   :  { %v1511_v51 = vmax.f32 %v1449_v48, %v1505_v45 }
 0x858   :  { %v1536_v55 = vmax.f32 %v1511_v51, %v1530_v46 }
 0x85d   :  { %v1508_v50 = vpop.f32.mrf.mxu0  ;;  %v1533_v53 = vpop.f32.mrf.mxu1 }
 0x85e   :  { %v1512_v52 = vmax.f32 %v1450_v49, %v1508_v50 }
 0x860   :  { %v1537_v54 = vmax.f32 %v1512_v52, %v1533_v53 }
 0x862   :  { %1967 = vmatpush.msk.msrb.mxu2 %vm224_vm0, %v1537_v54  ;;  %1969 = vmatpush.msk.msrb.mxu3 %vm224_vm0, %v1537_v54 }
 0x863   :  { %1976 = vmatpush.msk.msra.mxu0 %vm224_vm0, %v1537_v54 }
 0x864   :  { %1567 = vmatpush.msrb.mxu2 %v1536_v55  ;;  %1597 = vmatpush.msrb.mxu3 %v1536_v55 }
 0x865   :  { %1728 = vmatpush.msra.mxu0 %v1536_v55  ;;  %1970 = vmatmul.msk.f32.vlgmr.msrb.gmra.mxu3 %vm1545_vm1, %v1572_v56 }
 0x866   :  { %1973 = vmatpush.msk.msra.mxu2 %vm224_vm0, %v1537_v54  ;;  %1692 = vmatpush.msra.mxu3 %v1655_v63  ;;  %vm1602_vm0 = vcmask 392192  }
 0x867   :  { %1968 = vmatmul.msk.f32.vlgmr.msrb.gmra.mxu2 %vm1545_vm1, %v1538_v57 }
 0x868   :  { %1674 = vmatpush.msra.mxu2 %v1536_v55  ;;  %1693 = vmatpush.msra.mxu3 %v1654_v1 }
 0x86a   :  { %1694 = vmatpush.msra.mxu3 %v1653_v3  ;;  %1791 = vmatpush.msrb.mxu2 %v1761_v17 }
 0x86c   :  { %1695 = vmatpush.msra.mxu3 %v1652_v4  ;;  %1792 = vmatpush.msrb.mxu2 %v1760_v20 }
 0x86e   :  { %1696 = vmatpush.msra.mxu3 %v1651_v5  ;;  %1793 = vmatpush.msrb.mxu2 %v1759_v21 }
 0x86f   :  { %1974 = vmatmul.msk.f32.vlgmr.msra.gmra.mxu2 %vm1545_vm1, %v1649_v58 }
 0x870   :  { %1697 = vmatpush.msra.mxu3 %v1650_v6  ;;  %1794 = vmatpush.msrb.mxu2 %v1758_v22 }
 0x872   :  { %1817 = vmatpush.msrb.mxu3 %v1766_v23 }
 0x874   :  { %1818 = vmatpush.msrb.mxu3 %v1765_v24 }
 0x876   :  { %1819 = vmatpush.msrb.mxu3 %v1764_v33 }
 0x878   :  { %1820 = vmatpush.msrb.mxu3 %v1763_v34 }
 0x8e8   :  { %v1599_v8 = vpop.f32.mrf.mxu3 }
 0x8e9   :  { %1971 = vmatmul.msk.f32.vlgmr.msrb.gmra.mxu0 %vm1602_vm0, %v1599_v8 }
 0x8ea   :  { %v1569_v9 = vpop.f32.mrf.mxu2 }
 0x8eb   :  { %1972 = vmatmul.msk.f32.vlgmr.msrb.gmra.mxu1 %vm1602_vm0, %v1569_v9 }
 0x8f1   :  { %1977 = vmatmul.msk.f32.vlgmr.msra.gmra.mxu0 %vm1545_vm1, %v1703_v10 }
 0x8f2   :  { %v1676_v11 = vpop.f32.mrf.mxu2 }
 0x8f3   :  { %1975 = vmatmul.msk.f32.vlgmr.msra.gmra.mxu3 %vm1602_vm0, %v1676_v11 }
 0x966   :  { %v1623_v18 = vpop.f32.mrf.mxu0 }
 0x968   :  { %v1646_v25 = vpop.f32.mrf.mxu1 }
 0x969   :  { %v1647_v27 = vadd.f32 %v1646_v25, %v1623_v18 }
 0x96e   :  { %v1730_v19 = vpop.f32.mrf.mxu0 }
 0x96f   :  { %1978 = vmatmul.msk.f32.vlgmr.msra.gmra.mxu1 %vm1602_vm0, %v1730_v19 }
 0x976   :  { %v1699_v26 = vpop.f32.mrf.mxu3 }
 0x977   :  { %v1702_v28 = vadd.f32 %v1699_v26, %v1647_v27 }
 0x9ec   :  { %v1753_v30 = vpop.f32.mrf.mxu1 }
 0x9ed   :  { %v1756_v31 = vadd.f32 %v1753_v30, %v1702_v28 }
 0x9ef   :  { %v1771_v32 = vadd.f32 %v2030_v29, %v1756_v31 }
 0x9f1   :  { %1979 = vmatmul.msk.f32.vlgmr.msrb.gmra.mxu2 %vm1775_vm2, %v1771_v32 }
 0xa74   :  { %v1796_v36 = vpop.f32.mrf.mxu2 }
 0xa75   :  { %v1797_v37 = vadd.f32 %v2031_v35, %v1796_v36 }
 0xa77   :  { %1980 = vmatmul.msk.f32.vlgmr.msrb.gmra.mxu3 %vm1775_vm2, %v1797_v37 }
 0xafa   :  { %v1822_v39 = vpop.f32.mrf.mxu3 }
 0xafb   :  { %v1823_v40 = vadd.f32 %v2032_v38, %v1822_v39 }
 0xafd   :  { %1826 = vst.msk [vmem:[#allocation2] sm:$0x3] %vm1825_vm3, %v1823_v40 }
 0xafe   :  { %2060 = shalt.err (!%p2057_p4)
}
 0xaff   :  { %1837 = dma.vmem_to_hbm [thread:$0]  %s1833_s11, 32, %s1835_s0, [#allocation3]  }
 0xb00   :  { %2061 = dma.done.wait [#allocation3], 32  }
 0xb01   :  { %2062 = vsyncadd [#allocation3], 4294967264 }
 0xb02   :  { %1842 = vsyncpa [#allocation3], 1 }

</bundles_post_ra>
